<compile_context>
chip_gen: v7x
topology: tpu7x:2x2x1
jax: 0.10.0
libtpu: 0.0.40
codegen_flags: <defaults>
</compile_context>

<pallas_src>
import functools

import jax
import jax.numpy as jnp
from jax.experimental import pallas as pl
from jax.experimental.pallas import tpu as pltpu

LN_EPS = 1e-5  # torch.nn.LayerNorm default


def _erf(x):
    # Numerical-Recipes erfc approximation, |abs err| <= ~1e-4 with the approx reciprocal
    # (well inside the 2e-3 check). Only needs exp/mul/add/where + EUP reciprocal.
    a = jnp.abs(x)
    t = pl.reciprocal(1.0 + 0.5 * a, approx=True)
    poly = -1.26551223 + t * (1.00002368 + t * (0.37409196 + t * (0.09678418 +
           t * (-0.18628806 + t * (0.27886807 + t * (-1.13520398 + t * (1.48851587 +
           t * (-0.82215223 + t * 0.17087277))))))))
    erfc_a = t * jnp.exp(-a * a + poly)
    erf_a = 1.0 - erfc_a
    return jnp.where(x >= 0.0, erf_a, -erf_a)


def _gelu_exact(x):
    # torch.nn.GELU() default is the exact erf-based GELU.
    return 0.5 * x * (1.0 + _erf(x * 0.7071067811865476))


def _layernorm(x, gamma, beta):
    # E[x^2] - mu^2 form: both XLU reduces issue back-to-back (shorter dep chain).
    mu = jnp.mean(x, axis=-1, keepdims=True)
    ms = jnp.mean(x * x, axis=-1, keepdims=True)
    var = ms - mu * mu
    inv = jax.lax.rsqrt(var + LN_EPS)
    return (x - mu) * inv * gamma + beta


def _encoder_kernel(x_ref, wqkv_ref, wo_ref, w1_ref, w2_ref, vec_ref, o_ref,
                    *, batch, seq, num_heads, head_dim):
    M, D = x_ref.shape            # M = batch * seq (batch flattened into tokens)
    F = w1_ref.shape[1]
    qkv_dim = num_heads * head_dim

    # Packed small-vector slab: rows = [ln1_g, ln1_b, bo, ln2_g, ln2_b, b1, b2, pad].
    g1 = vec_ref[0:1, :D]
    be1 = vec_ref[1:2, :D]
    bo = vec_ref[2:3, :D]
    g2 = vec_ref[3:4, :D]
    be2 = vec_ref[4:5, :D]
    b1 = vec_ref[5:6, :F]
    b2 = vec_ref[6:7, :D]

    wqkv = wqkv_ref[...]   # (D, 3*qkv_dim), attention scale already folded into the Q block
    wo = wo_ref[...]       # (qkv_dim, D)
    w1 = w1_ref[...]       # (D, F)
    w2 = w2_ref[...]       # (F, D)

    x = x_ref[...]                                                    # (M, D)

    # ---- attention branch: LayerNorm -> MultiHeadedSelfAttention ----
    h = _layernorm(x, g1, be1)
    qkv = jnp.dot(h, wqkv, preferred_element_type=jnp.float32)        # (M, 3*qkv_dim)
    q = qkv[:, 0:qkv_dim]              # 128-lane-aligned splits
    k = qkv[:, qkv_dim:2 * qkv_dim]
    v = qkv[:, 2 * qkv_dim:3 * qkv_dim]

    # Per-(batch, head) loop only for the tiny (S,S) score / P@V matmuls.
    nt_dims = (((1,), (1,)), ((), ()))     # contract both operands on their last dim (no .T)
    ctx_rows = []
    for b in range(batch):                 # static unroll, batch*num_heads small matmuls
        rs = slice(b * seq, (b + 1) * seq)
        heads = []
        for hd in range(num_heads):
            cs = slice(hd * head_dim, (hd + 1) * head_dim)
            s = jax.lax.dot_general(q[rs, cs], k[rs, cs], nt_dims,
                                    preferred_element_type=jnp.float32)   # (S, S), pre-scaled
            s = s - jnp.max(s, axis=-1, keepdims=True)
            e = jnp.exp(s)
            p = e * pl.reciprocal(jnp.sum(e, axis=-1, keepdims=True), approx=True)
            heads.append(jnp.dot(p, v[rs, cs], preferred_element_type=jnp.float32))
        ctx_rows.append(jnp.concatenate(heads, axis=-1))              # (S, H*Dh)
    ctx = jnp.concatenate(ctx_rows, axis=0)                           # (M, H*Dh)

    attn = jnp.dot(ctx, wo, preferred_element_type=jnp.float32) + bo  # (M, D)
    x1 = x + attn                          # residual 1

    # ---- feed-forward branch: LayerNorm -> Linear -> GELU -> Linear ----
    h2 = _layernorm(x1, g2, be2)
    m = _gelu_exact(jnp.dot(h2, w1, preferred_element_type=jnp.float32) + b1)
    f = jnp.dot(m, w2, preferred_element_type=jnp.float32) + b2
    o_ref[...] = x1 + f                    # residual 2 — single full-block store


def pack_params(params):
    """One-time host-side packing (NOT per forward call)."""
    D = params["wq"].shape[0]
    F = params["w1"].shape[1]
    # Fused QKV weight with the attention scale folded into the Q block.
    wqkv = jnp.concatenate(
        [params["wq"] * params["scale"], params["wk"], params["wv"]], axis=1)
    # (8, 128) lane-dense slab for the seven tiny gamma/beta/bias vectors -> one DMA.
    slab_w = max(128, ((max(D, F) + 127) // 128) * 128)

    def row(v):
        v = v.reshape(-1).astype(jnp.float32)
        return jnp.pad(v, (0, slab_w - v.shape[0]))

    slab = jnp.stack([row(params["ln1_g"]), row(params["ln1_b"]), row(params["bo"]),
                      row(params["ln2_g"]), row(params["ln2_b"]), row(params["b1"]),
                      row(params["b2"]), jnp.zeros((slab_w,), jnp.float32)])
    return dict(num_heads=params["num_heads"], head_dim=params["head_dim"],
                wqkv=wqkv, wo=params["wo"], w1=params["w1"], w2=params["w2"], slab=slab)


@functools.partial(jax.jit, static_argnames=("num_heads", "head_dim"))
def _encoder_call(x, wqkv, wo, w1, w2, slab, *, num_heads, head_dim):
    B, S, D = x.shape
    M = B * S
    xf = x.reshape(M, D)                   # batch flattened into tokens (fuses under jit)

    kernel = functools.partial(_encoder_kernel, batch=B, seq=S,
                               num_heads=num_heads, head_dim=head_dim)

    # Single grid step on all chip generations: total work is a few µs, so per-step overhead
    # and weight-residency duplication dominate any multi-core split at this size.
    out = pl.pallas_call(
        kernel,
        grid=(1,),
        in_specs=[
            pl.BlockSpec((M, D), lambda i: (0, 0)),
            pl.BlockSpec(wqkv.shape, lambda i: (0, 0)),
            pl.BlockSpec(wo.shape, lambda i: (0, 0)),
            pl.BlockSpec(w1.shape, lambda i: (0, 0)),
            pl.BlockSpec(w2.shape, lambda i: (0, 0)),
            pl.BlockSpec(slab.shape, lambda i: (0, 0)),
        ],
        out_specs=pl.BlockSpec((M, D), lambda i: (0, 0)),
        out_shape=jax.ShapeDtypeStruct((M, D), x.dtype),
        compiler_params=pltpu.CompilerParams(dimension_semantics=("arbitrary",)),
    )(xf, wqkv, wo, w1, w2, slab)
    return out.reshape(B, S, D)


def transformer_encoder_forward(x, packed):
    return _encoder_call(x, packed["wqkv"], packed["wo"], packed["w1"], packed["w2"],
                         packed["slab"], num_heads=packed["num_heads"],
                         head_dim=packed["head_dim"])


def reference(x, params):
    # plain-JAX mirror of the PyTorch forward (eval mode), for a sanity check
    def ln(t, g, b):
        mu = t.mean(-1, keepdims=True)
        var = ((t - mu) ** 2).mean(-1, keepdims=True)
        return (t - mu) / jnp.sqrt(var + LN_EPS) * g + b

    H, Dh = params["num_heads"], params["head_dim"]
    B, S, _ = x.shape
    h = ln(x, params["ln1_g"], params["ln1_b"])
    q, k, v = h @ params["wq"], h @ params["wk"], h @ params["wv"]
    split = lambda t: t.reshape(B, S, H, Dh).transpose(0, 2, 1, 3)
    q, k, v = split(q), split(k), split(v)
    s = jnp.einsum("bhqd,bhkd->bhqk", q, k) * params["scale"]
    p = jax.nn.softmax(s, axis=-1)
    ctx = jnp.einsum("bhqk,bhkd->bhqd", p, v).transpose(0, 2, 1, 3).reshape(B, S, H * Dh)
    x1 = x + ctx @ params["wo"] + params["bo"]
    h2 = ln(x1, params["ln2_g"], params["ln2_b"])
    m = jax.nn.gelu(h2 @ params["w1"] + params["b1"], approximate=False)
    return x1 + m @ params["w2"] + params["b2"]


if __name__ == "__main__":
    B, S = 2, 8
    embed_dim = 32
    num_heads = 4
    attention_head_dim = 8
    mlp_head_dim = 64
    head_dim = attention_head_dim * num_heads       # module's per-head "hidden_dim" quirk
    qkv_dim = num_heads * head_dim                  # QKV projection output width

    f32 = jnp.float32
    ks = jax.random.split(jax.random.PRNGKey(0), 12)
    params = dict(
        num_heads=num_heads,
        head_dim=head_dim,
        scale=float(attention_head_dim ** -0.5),
        ln1_g=jnp.ones((1, embed_dim), f32) + 0.05 * jax.random.normal(ks[0], (1, embed_dim), f32),
        ln1_b=0.05 * jax.random.normal(ks[1], (1, embed_dim), f32),
        wq=0.05 * jax.random.normal(ks[2], (embed_dim, qkv_dim), f32),
        wk=0.05 * jax.random.normal(ks[3], (embed_dim, qkv_dim), f32),
        wv=0.05 * jax.random.normal(ks[4], (embed_dim, qkv_dim), f32),
        wo=0.05 * jax.random.normal(ks[5], (qkv_dim, embed_dim), f32),
        bo=0.05 * jax.random.normal(ks[6], (1, embed_dim), f32),
        ln2_g=jnp.ones((1, embed_dim), f32) + 0.05 * jax.random.normal(ks[7], (1, embed_dim), f32),
        ln2_b=0.05 * jax.random.normal(ks[8], (1, embed_dim), f32),
        w1=0.05 * jax.random.normal(ks[9], (embed_dim, mlp_head_dim), f32),
        b1=0.05 * jax.random.normal(ks[10], (1, mlp_head_dim), f32),
        w2=0.05 * jax.random.normal(ks[11], (mlp_head_dim, embed_dim), f32),
        b2=jnp.zeros((1, embed_dim), f32),
    )

    x = jax.random.normal(jax.random.PRNGKey(1), (B, S, embed_dim), f32)

    packed = jax.tree_util.tree_map(
        lambda a: jax.block_until_ready(a) if isinstance(a, jax.Array) else a,
        pack_params(params))                       # one-time packing, outside the forward path

    out = jax.block_until_ready(transformer_encoder_forward(x, packed))
    ref = reference(x, params)

    assert out.shape == (B, S, embed_dim)
    assert bool(jnp.allclose(out, ref, atol=2e-3, rtol=2e-3))
    print("KERNEL_OK")
</pallas_src>

<mosaic_0001>
module attributes {stable_mosaic.version = 11 : i64} {
  func.func @_encoder_kernel(%arg0: i32, %arg1: memref<16x32xf32, #tpu.memory_space<vmem>>, %arg2: memref<32x384xf32, #tpu.memory_space<vmem>>, %arg3: memref<128x32xf32, #tpu.memory_space<vmem>>, %arg4: memref<32x64xf32, #tpu.memory_space<vmem>>, %arg5: memref<64x32xf32, #tpu.memory_space<vmem>>, %arg6: memref<8x128xf32, #tpu.memory_space<vmem>>, %arg7: memref<16x32xf32, #tpu.memory_space<vmem>>) attributes {dimension_semantics = [#tpu.dimension_semantics<arbitrary>], iteration_bounds = array<i64: 1>, scalar_prefetch = 0 : i64, scratch_operands = 0 : i64, tpu.core_type = #tpu.core_type<tc>, window_params = [{pipeline_mode = #tpu.pipeline_mode<synchronous>, transform_indices = @transform_0, window_bounds = array<i64: 16, 32>}, {pipeline_mode = #tpu.pipeline_mode<synchronous>, transform_indices = @transform_1, window_bounds = array<i64: 32, 384>}, {pipeline_mode = #tpu.pipeline_mode<synchronous>, transform_indices = @transform_2, window_bounds = array<i64: 128, 32>}, {pipeline_mode = #tpu.pipeline_mode<synchronous>, transform_indices = @transform_3, window_bounds = array<i64: 32, 64>}, {pipeline_mode = #tpu.pipeline_mode<synchronous>, transform_indices = @transform_4, window_bounds = array<i64: 64, 32>}, {pipeline_mode = #tpu.pipeline_mode<synchronous>, transform_indices = @transform_5, window_bounds = array<i64: 8, 128>}, {pipeline_mode = #tpu.pipeline_mode<synchronous>, transform_indices = @transform_6, window_bounds = array<i64: 16, 32>}]} {
    %c0 = arith.constant 0 : index
    %c0_0 = arith.constant 0 : index
    %0 = vector.load %arg6[%c0, %c0_0] : memref<8x128xf32, #tpu.memory_space<vmem>>, vector<1x32xf32>
    %c1 = arith.constant 1 : index
    %c0_1 = arith.constant 0 : index
    %1 = vector.load %arg6[%c1, %c0_1] : memref<8x128xf32, #tpu.memory_space<vmem>>, vector<1x32xf32>
    %c2 = arith.constant 2 : index
    %c0_2 = arith.constant 0 : index
    %2 = vector.load %arg6[%c2, %c0_2] : memref<8x128xf32, #tpu.memory_space<vmem>>, vector<1x32xf32>
    %c3 = arith.constant 3 : index
    %c0_3 = arith.constant 0 : index
    %3 = vector.load %arg6[%c3, %c0_3] : memref<8x128xf32, #tpu.memory_space<vmem>>, vector<1x32xf32>
    %c4 = arith.constant 4 : index
    %c0_4 = arith.constant 0 : index
    %4 = vector.load %arg6[%c4, %c0_4] : memref<8x128xf32, #tpu.memory_space<vmem>>, vector<1x32xf32>
    %c5 = arith.constant 5 : index
    %c0_5 = arith.constant 0 : index
    %5 = vector.load %arg6[%c5, %c0_5] : memref<8x128xf32, #tpu.memory_space<vmem>>, vector<1x64xf32>
    %c6 = arith.constant 6 : index
    %c0_6 = arith.constant 0 : index
    %6 = vector.load %arg6[%c6, %c0_6] : memref<8x128xf32, #tpu.memory_space<vmem>>, vector<1x32xf32>
    %c0_7 = arith.constant 0 : index
    %c0_8 = arith.constant 0 : index
    %7 = vector.load %arg2[%c0_7, %c0_8] : memref<32x384xf32, #tpu.memory_space<vmem>>, vector<32x384xf32>
    %c0_9 = arith.constant 0 : index
    %c0_10 = arith.constant 0 : index
    %8 = vector.load %arg3[%c0_9, %c0_10] : memref<128x32xf32, #tpu.memory_space<vmem>>, vector<128x32xf32>
    %c0_11 = arith.constant 0 : index
    %c0_12 = arith.constant 0 : index
    %9 = vector.load %arg4[%c0_11, %c0_12] : memref<32x64xf32, #tpu.memory_space<vmem>>, vector<32x64xf32>
    %c0_13 = arith.constant 0 : index
    %c0_14 = arith.constant 0 : index
    %10 = vector.load %arg5[%c0_13, %c0_14] : memref<64x32xf32, #tpu.memory_space<vmem>>, vector<64x32xf32>
    %c0_15 = arith.constant 0 : index
    %c0_16 = arith.constant 0 : index
    %11 = vector.load %arg1[%c0_15, %c0_16] : memref<16x32xf32, #tpu.memory_space<vmem>>, vector<16x32xf32>
    %cst = arith.constant dense<0.000000e+00> : vector<16xf32>
    %12 = vector.multi_reduction <add>, %11, %cst [1] : vector<16x32xf32> to vector<16xf32>
    %13 = vector.shape_cast %12 : vector<16xf32> to vector<16x1xf32>
    %cst_17 = arith.constant 3.200000e+01 : f32
    %14 = vector.broadcast %cst_17 : f32 to vector<16x1xf32>
    %15 = arith.divf %13, %14 : vector<16x1xf32>
    %16 = arith.mulf %11, %11 : vector<16x32xf32>
    %cst_18 = arith.constant dense<0.000000e+00> : vector<16xf32>
    %17 = vector.multi_reduction <add>, %16, %cst_18 [1] : vector<16x32xf32> to vector<16xf32>
    %18 = vector.shape_cast %17 : vector<16xf32> to vector<16x1xf32>
    %cst_19 = arith.constant 3.200000e+01 : f32
    %19 = vector.broadcast %cst_19 : f32 to vector<16x1xf32>
    %20 = arith.divf %18, %19 : vector<16x1xf32>
    %21 = arith.mulf %15, %15 : vector<16x1xf32>
    %22 = arith.subf %20, %21 : vector<16x1xf32>
    %cst_20 = arith.constant 9.99999974E-6 : f32
    %23 = vector.broadcast %cst_20 : f32 to vector<16x1xf32>
    %24 = arith.addf %22, %23 : vector<16x1xf32>
    %25 = math.rsqrt %24 : vector<16x1xf32>
    %26 = vector.broadcast %15 : vector<16x1xf32> to vector<16x32xf32>
    %27 = arith.subf %11, %26 : vector<16x32xf32>
    %28 = vector.broadcast %25 : vector<16x1xf32> to vector<16x32xf32>
    %29 = arith.mulf %27, %28 : vector<16x32xf32>
    %30 = vector.broadcast %0 : vector<1x32xf32> to vector<16x32xf32>
    %31 = arith.mulf %29, %30 : vector<16x32xf32>
    %32 = vector.broadcast %1 : vector<1x32xf32> to vector<16x32xf32>
    %33 = arith.addf %31, %32 : vector<16x32xf32>
    %cst_21 = arith.constant dense<0.000000e+00> : vector<16x384xf32>
    %34 = tpu.matmul %33, %7, %cst_21 {dimension_numbers = #tpu.dot_dimension_numbers<[1], [0], [0], [1], [0, 0, 1, 1], [], []>} : vector<16x32xf32>, vector<32x384xf32>, vector<16x384xf32> -> vector<16x384xf32>
    %35 = vector.extract_strided_slice %34 {offsets = [0, 0], sizes = [16, 128], strides = [1, 1]} : vector<16x384xf32> to vector<16x128xf32>
    %36 = vector.extract_strided_slice %34 {offsets = [0, 128], sizes = [16, 128], strides = [1, 1]} : vector<16x384xf32> to vector<16x128xf32>
    %37 = vector.extract_strided_slice %34 {offsets = [0, 256], sizes = [16, 128], strides = [1, 1]} : vector<16x384xf32> to vector<16x128xf32>
    %38 = vector.extract_strided_slice %35 {offsets = [0, 0], sizes = [8, 32], strides = [1, 1]} : vector<16x128xf32> to vector<8x32xf32>
    %39 = vector.extract_strided_slice %36 {offsets = [0, 0], sizes = [8, 32], strides = [1, 1]} : vector<16x128xf32> to vector<8x32xf32>
    %cst_22 = arith.constant dense<0.000000e+00> : vector<8x8xf32>
    %40 = tpu.matmul %38, %39, %cst_22 {dimension_numbers = #tpu.dot_dimension_numbers<[1], [1], [0], [0], [0, 0, 1, 0], [], []>} : vector<8x32xf32>, vector<8x32xf32>, vector<8x8xf32> -> vector<8x8xf32>
    %cst_23 = arith.constant dense<0xFF800000> : vector<8xf32>
    %41 = vector.multi_reduction <maximumf>, %40, %cst_23 [1] : vector<8x8xf32> to vector<8xf32>
    %42 = vector.shape_cast %41 : vector<8xf32> to vector<8x1xf32>
    %43 = vector.broadcast %42 : vector<8x1xf32> to vector<8x8xf32>
    %44 = arith.subf %40, %43 : vector<8x8xf32>
    %45 = math.exp %44 : vector<8x8xf32>
    %cst_24 = arith.constant dense<0.000000e+00> : vector<8xf32>
    %46 = vector.multi_reduction <add>, %45, %cst_24 [1] : vector<8x8xf32> to vector<8xf32>
    %47 = vector.shape_cast %46 : vector<8xf32> to vector<8x1xf32>
    %48 = tpu.reciprocal %47 {approx = true} : vector<8x1xf32> -> vector<8x1xf32>
    %49 = vector.broadcast %48 : vector<8x1xf32> to vector<8x8xf32>
    %50 = arith.mulf %45, %49 : vector<8x8xf32>
    %51 = vector.extract_strided_slice %37 {offsets = [0, 0], sizes = [8, 32], strides = [1, 1]} : vector<16x128xf32> to vector<8x32xf32>
    %cst_25 = arith.constant dense<0.000000e+00> : vector<8x32xf32>
    %52 = tpu.matmul %50, %51, %cst_25 {dimension_numbers = #tpu.dot_dimension_numbers<[1], [0], [0], [1], [0, 0, 1, 1], [], []>} : vector<8x8xf32>, vector<8x32xf32>, vector<8x32xf32> -> vector<8x32xf32>
    %53 = vector.extract_strided_slice %35 {offsets = [0, 32], sizes = [8, 32], strides = [1, 1]} : vector<16x128xf32> to vector<8x32xf32>
    %54 = vector.extract_strided_slice %36 {offsets = [0, 32], sizes = [8, 32], strides = [1, 1]} : vector<16x128xf32> to vector<8x32xf32>
    %cst_26 = arith.constant dense<0.000000e+00> : vector<8x8xf32>
    %55 = tpu.matmul %53, %54, %cst_26 {dimension_numbers = #tpu.dot_dimension_numbers<[1], [1], [0], [0], [0, 0, 1, 0], [], []>} : vector<8x32xf32>, vector<8x32xf32>, vector<8x8xf32> -> vector<8x8xf32>
    %cst_27 = arith.constant dense<0xFF800000> : vector<8xf32>
    %56 = vector.multi_reduction <maximumf>, %55, %cst_27 [1] : vector<8x8xf32> to vector<8xf32>
    %57 = vector.shape_cast %56 : vector<8xf32> to vector<8x1xf32>
    %58 = vector.broadcast %57 : vector<8x1xf32> to vector<8x8xf32>
    %59 = arith.subf %55, %58 : vector<8x8xf32>
    %60 = math.exp %59 : vector<8x8xf32>
    %cst_28 = arith.constant dense<0.000000e+00> : vector<8xf32>
    %61 = vector.multi_reduction <add>, %60, %cst_28 [1] : vector<8x8xf32> to vector<8xf32>
    %62 = vector.shape_cast %61 : vector<8xf32> to vector<8x1xf32>
    %63 = tpu.reciprocal %62 {approx = true} : vector<8x1xf32> -> vector<8x1xf32>
    %64 = vector.broadcast %63 : vector<8x1xf32> to vector<8x8xf32>
    %65 = arith.mulf %60, %64 : vector<8x8xf32>
    %66 = vector.extract_strided_slice %37 {offsets = [0, 32], sizes = [8, 32], strides = [1, 1]} : vector<16x128xf32> to vector<8x32xf32>
    %cst_29 = arith.constant dense<0.000000e+00> : vector<8x32xf32>
    %67 = tpu.matmul %65, %66, %cst_29 {dimension_numbers = #tpu.dot_dimension_numbers<[1], [0], [0], [1], [0, 0, 1, 1], [], []>} : vector<8x8xf32>, vector<8x32xf32>, vector<8x32xf32> -> vector<8x32xf32>
    %68 = vector.extract_strided_slice %35 {offsets = [0, 64], sizes = [8, 32], strides = [1, 1]} : vector<16x128xf32> to vector<8x32xf32>
    %69 = vector.extract_strided_slice %36 {offsets = [0, 64], sizes = [8, 32], strides = [1, 1]} : vector<16x128xf32> to vector<8x32xf32>
    %cst_30 = arith.constant dense<0.000000e+00> : vector<8x8xf32>
    %70 = tpu.matmul %68, %69, %cst_30 {dimension_numbers = #tpu.dot_dimension_numbers<[1], [1], [0], [0], [0, 0, 1, 0], [], []>} : vector<8x32xf32>, vector<8x32xf32>, vector<8x8xf32> -> vector<8x8xf32>
    %cst_31 = arith.constant dense<0xFF800000> : vector<8xf32>
    %71 = vector.multi_reduction <maximumf>, %70, %cst_31 [1] : vector<8x8xf32> to vector<8xf32>
    %72 = vector.shape_cast %71 : vector<8xf32> to vector<8x1xf32>
    %73 = vector.broadcast %72 : vector<8x1xf32> to vector<8x8xf32>
    %74 = arith.subf %70, %73 : vector<8x8xf32>
    %75 = math.exp %74 : vector<8x8xf32>
    %cst_32 = arith.constant dense<0.000000e+00> : vector<8xf32>
    %76 = vector.multi_reduction <add>, %75, %cst_32 [1] : vector<8x8xf32> to vector<8xf32>
    %77 = vector.shape_cast %76 : vector<8xf32> to vector<8x1xf32>
    %78 = tpu.reciprocal %77 {approx = true} : vector<8x1xf32> -> vector<8x1xf32>
    %79 = vector.broadcast %78 : vector<8x1xf32> to vector<8x8xf32>
    %80 = arith.mulf %75, %79 : vector<8x8xf32>
    %81 = vector.extract_strided_slice %37 {offsets = [0, 64], sizes = [8, 32], strides = [1, 1]} : vector<16x128xf32> to vector<8x32xf32>
    %cst_33 = arith.constant dense<0.000000e+00> : vector<8x32xf32>
    %82 = tpu.matmul %80, %81, %cst_33 {dimension_numbers = #tpu.dot_dimension_numbers<[1], [0], [0], [1], [0, 0, 1, 1], [], []>} : vector<8x8xf32>, vector<8x32xf32>, vector<8x32xf32> -> vector<8x32xf32>
    %83 = vector.extract_strided_slice %35 {offsets = [0, 96], sizes = [8, 32], strides = [1, 1]} : vector<16x128xf32> to vector<8x32xf32>
    %84 = vector.extract_strided_slice %36 {offsets = [0, 96], sizes = [8, 32], strides = [1, 1]} : vector<16x128xf32> to vector<8x32xf32>
    %cst_34 = arith.constant dense<0.000000e+00> : vector<8x8xf32>
    %85 = tpu.matmul %83, %84, %cst_34 {dimension_numbers = #tpu.dot_dimension_numbers<[1], [1], [0], [0], [0, 0, 1, 0], [], []>} : vector<8x32xf32>, vector<8x32xf32>, vector<8x8xf32> -> vector<8x8xf32>
    %cst_35 = arith.constant dense<0xFF800000> : vector<8xf32>
    %86 = vector.multi_reduction <maximumf>, %85, %cst_35 [1] : vector<8x8xf32> to vector<8xf32>
    %87 = vector.shape_cast %86 : vector<8xf32> to vector<8x1xf32>
    %88 = vector.broadcast %87 : vector<8x1xf32> to vector<8x8xf32>
    %89 = arith.subf %85, %88 : vector<8x8xf32>
    %90 = math.exp %89 : vector<8x8xf32>
    %cst_36 = arith.constant dense<0.000000e+00> : vector<8xf32>
    %91 = vector.multi_reduction <add>, %90, %cst_36 [1] : vector<8x8xf32> to vector<8xf32>
    %92 = vector.shape_cast %91 : vector<8xf32> to vector<8x1xf32>
    %93 = tpu.reciprocal %92 {approx = true} : vector<8x1xf32> -> vector<8x1xf32>
    %94 = vector.broadcast %93 : vector<8x1xf32> to vector<8x8xf32>
    %95 = arith.mulf %90, %94 : vector<8x8xf32>
    %96 = vector.extract_strided_slice %37 {offsets = [0, 96], sizes = [8, 32], strides = [1, 1]} : vector<16x128xf32> to vector<8x32xf32>
    %cst_37 = arith.constant dense<0.000000e+00> : vector<8x32xf32>
    %97 = tpu.matmul %95, %96, %cst_37 {dimension_numbers = #tpu.dot_dimension_numbers<[1], [0], [0], [1], [0, 0, 1, 1], [], []>} : vector<8x8xf32>, vector<8x32xf32>, vector<8x32xf32> -> vector<8x32xf32>
    %98 = tpu.concatenate %52, %67, %82, %97 in 1 : vector<8x32xf32>, vector<8x32xf32>, vector<8x32xf32>, vector<8x32xf32> -> vector<8x128xf32>
    %99 = vector.extract_strided_slice %35 {offsets = [8, 0], sizes = [8, 32], strides = [1, 1]} : vector<16x128xf32> to vector<8x32xf32>
    %100 = vector.extract_strided_slice %36 {offsets = [8, 0], sizes = [8, 32], strides = [1, 1]} : vector<16x128xf32> to vector<8x32xf32>
    %cst_38 = arith.constant dense<0.000000e+00> : vector<8x8xf32>
    %101 = tpu.matmul %99, %100, %cst_38 {dimension_numbers = #tpu.dot_dimension_numbers<[1], [1], [0], [0], [0, 0, 1, 0], [], []>} : vector<8x32xf32>, vector<8x32xf32>, vector<8x8xf32> -> vector<8x8xf32>
    %cst_39 = arith.constant dense<0xFF800000> : vector<8xf32>
    %102 = vector.multi_reduction <maximumf>, %101, %cst_39 [1] : vector<8x8xf32> to vector<8xf32>
    %103 = vector.shape_cast %102 : vector<8xf32> to vector<8x1xf32>
    %104 = vector.broadcast %103 : vector<8x1xf32> to vector<8x8xf32>
    %105 = arith.subf %101, %104 : vector<8x8xf32>
    %106 = math.exp %105 : vector<8x8xf32>
    %cst_40 = arith.constant dense<0.000000e+00> : vector<8xf32>
    %107 = vector.multi_reduction <add>, %106, %cst_40 [1] : vector<8x8xf32> to vector<8xf32>
    %108 = vector.shape_cast %107 : vector<8xf32> to vector<8x1xf32>
    %109 = tpu.reciprocal %108 {approx = true} : vector<8x1xf32> -> vector<8x1xf32>
    %110 = vector.broadcast %109 : vector<8x1xf32> to vector<8x8xf32>
    %111 = arith.mulf %106, %110 : vector<8x8xf32>
    %112 = vector.extract_strided_slice %37 {offsets = [8, 0], sizes = [8, 32], strides = [1, 1]} : vector<16x128xf32> to vector<8x32xf32>
    %cst_41 = arith.constant dense<0.000000e+00> : vector<8x32xf32>
    %113 = tpu.matmul %111, %112, %cst_41 {dimension_numbers = #tpu.dot_dimension_numbers<[1], [0], [0], [1], [0, 0, 1, 1], [], []>} : vector<8x8xf32>, vector<8x32xf32>, vector<8x32xf32> -> vector<8x32xf32>
    %114 = vector.extract_strided_slice %35 {offsets = [8, 32], sizes = [8, 32], strides = [1, 1]} : vector<16x128xf32> to vector<8x32xf32>
    %115 = vector.extract_strided_slice %36 {offsets = [8, 32], sizes = [8, 32], strides = [1, 1]} : vector<16x128xf32> to vector<8x32xf32>
    %cst_42 = arith.constant dense<0.000000e+00> : vector<8x8xf32>
    %116 = tpu.matmul %114, %115, %cst_42 {dimension_numbers = #tpu.dot_dimension_numbers<[1], [1], [0], [0], [0, 0, 1, 0], [], []>} : vector<8x32xf32>, vector<8x32xf32>, vector<8x8xf32> -> vector<8x8xf32>
    %cst_43 = arith.constant dense<0xFF800000> : vector<8xf32>
    %117 = vector.multi_reduction <maximumf>, %116, %cst_43 [1] : vector<8x8xf32> to vector<8xf32>
    %118 = vector.shape_cast %117 : vector<8xf32> to vector<8x1xf32>
    %119 = vector.broadcast %118 : vector<8x1xf32> to vector<8x8xf32>
    %120 = arith.subf %116, %119 : vector<8x8xf32>
    %121 = math.exp %120 : vector<8x8xf32>
    %cst_44 = arith.constant dense<0.000000e+00> : vector<8xf32>
    %122 = vector.multi_reduction <add>, %121, %cst_44 [1] : vector<8x8xf32> to vector<8xf32>
    %123 = vector.shape_cast %122 : vector<8xf32> to vector<8x1xf32>
    %124 = tpu.reciprocal %123 {approx = true} : vector<8x1xf32> -> vector<8x1xf32>
    %125 = vector.broadcast %124 : vector<8x1xf32> to vector<8x8xf32>
    %126 = arith.mulf %121, %125 : vector<8x8xf32>
    %127 = vector.extract_strided_slice %37 {offsets = [8, 32], sizes = [8, 32], strides = [1, 1]} : vector<16x128xf32> to vector<8x32xf32>
    %cst_45 = arith.constant dense<0.000000e+00> : vector<8x32xf32>
    %128 = tpu.matmul %126, %127, %cst_45 {dimension_numbers = #tpu.dot_dimension_numbers<[1], [0], [0], [1], [0, 0, 1, 1], [], []>} : vector<8x8xf32>, vector<8x32xf32>, vector<8x32xf32> -> vector<8x32xf32>
    %129 = vector.extract_strided_slice %35 {offsets = [8, 64], sizes = [8, 32], strides = [1, 1]} : vector<16x128xf32> to vector<8x32xf32>
    %130 = vector.extract_strided_slice %36 {offsets = [8, 64], sizes = [8, 32], strides = [1, 1]} : vector<16x128xf32> to vector<8x32xf32>
    %cst_46 = arith.constant dense<0.000000e+00> : vector<8x8xf32>
    %131 = tpu.matmul %129, %130, %cst_46 {dimension_numbers = #tpu.dot_dimension_numbers<[1], [1], [0], [0], [0, 0, 1, 0], [], []>} : vector<8x32xf32>, vector<8x32xf32>, vector<8x8xf32> -> vector<8x8xf32>
    %cst_47 = arith.constant dense<0xFF800000> : vector<8xf32>
    %132 = vector.multi_reduction <maximumf>, %131, %cst_47 [1] : vector<8x8xf32> to vector<8xf32>
    %133 = vector.shape_cast %132 : vector<8xf32> to vector<8x1xf32>
    %134 = vector.broadcast %133 : vector<8x1xf32> to vector<8x8xf32>
    %135 = arith.subf %131, %134 : vector<8x8xf32>
    %136 = math.exp %135 : vector<8x8xf32>
    %cst_48 = arith.constant dense<0.000000e+00> : vector<8xf32>
    %137 = vector.multi_reduction <add>, %136, %cst_48 [1] : vector<8x8xf32> to vector<8xf32>
    %138 = vector.shape_cast %137 : vector<8xf32> to vector<8x1xf32>
    %139 = tpu.reciprocal %138 {approx = true} : vector<8x1xf32> -> vector<8x1xf32>
    %140 = vector.broadcast %139 : vector<8x1xf32> to vector<8x8xf32>
    %141 = arith.mulf %136, %140 : vector<8x8xf32>
    %142 = vector.extract_strided_slice %37 {offsets = [8, 64], sizes = [8, 32], strides = [1, 1]} : vector<16x128xf32> to vector<8x32xf32>
    %cst_49 = arith.constant dense<0.000000e+00> : vector<8x32xf32>
    %143 = tpu.matmul %141, %142, %cst_49 {dimension_numbers = #tpu.dot_dimension_numbers<[1], [0], [0], [1], [0, 0, 1, 1], [], []>} : vector<8x8xf32>, vector<8x32xf32>, vector<8x32xf32> -> vector<8x32xf32>
    %144 = vector.extract_strided_slice %35 {offsets = [8, 96], sizes = [8, 32], strides = [1, 1]} : vector<16x128xf32> to vector<8x32xf32>
    %145 = vector.extract_strided_slice %36 {offsets = [8, 96], sizes = [8, 32], strides = [1, 1]} : vector<16x128xf32> to vector<8x32xf32>
    %cst_50 = arith.constant dense<0.000000e+00> : vector<8x8xf32>
    %146 = tpu.matmul %144, %145, %cst_50 {dimension_numbers = #tpu.dot_dimension_numbers<[1], [1], [0], [0], [0, 0, 1, 0], [], []>} : vector<8x32xf32>, vector<8x32xf32>, vector<8x8xf32> -> vector<8x8xf32>
    %cst_51 = arith.constant dense<0xFF800000> : vector<8xf32>
    %147 = vector.multi_reduction <maximumf>, %146, %cst_51 [1] : vector<8x8xf32> to vector<8xf32>
    %148 = vector.shape_cast %147 : vector<8xf32> to vector<8x1xf32>
    %149 = vector.broadcast %148 : vector<8x1xf32> to vector<8x8xf32>
    %150 = arith.subf %146, %149 : vector<8x8xf32>
    %151 = math.exp %150 : vector<8x8xf32>
    %cst_52 = arith.constant dense<0.000000e+00> : vector<8xf32>
    %152 = vector.multi_reduction <add>, %151, %cst_52 [1] : vector<8x8xf32> to vector<8xf32>
    %153 = vector.shape_cast %152 : vector<8xf32> to vector<8x1xf32>
    %154 = tpu.reciprocal %153 {approx = true} : vector<8x1xf32> -> vector<8x1xf32>
    %155 = vector.broadcast %154 : vector<8x1xf32> to vector<8x8xf32>
    %156 = arith.mulf %151, %155 : vector<8x8xf32>
    %157 = vector.extract_strided_slice %37 {offsets = [8, 96], sizes = [8, 32], strides = [1, 1]} : vector<16x128xf32> to vector<8x32xf32>
    %cst_53 = arith.constant dense<0.000000e+00> : vector<8x32xf32>
    %158 = tpu.matmul %156, %157, %cst_53 {dimension_numbers = #tpu.dot_dimension_numbers<[1], [0], [0], [1], [0, 0, 1, 1], [], []>} : vector<8x8xf32>, vector<8x32xf32>, vector<8x32xf32> -> vector<8x32xf32>
    %159 = tpu.concatenate %113, %128, %143, %158 in 1 : vector<8x32xf32>, vector<8x32xf32>, vector<8x32xf32>, vector<8x32xf32> -> vector<8x128xf32>
    %160 = tpu.concatenate %98, %159 in 0 : vector<8x128xf32>, vector<8x128xf32> -> vector<16x128xf32>
    %cst_54 = arith.constant dense<0.000000e+00> : vector<16x32xf32>
    %161 = tpu.matmul %160, %8, %cst_54 {dimension_numbers = #tpu.dot_dimension_numbers<[1], [0], [0], [1], [0, 0, 1, 1], [], []>} : vector<16x128xf32>, vector<128x32xf32>, vector<16x32xf32> -> vector<16x32xf32>
    %162 = vector.broadcast %2 : vector<1x32xf32> to vector<16x32xf32>
    %163 = arith.addf %161, %162 : vector<16x32xf32>
    %164 = arith.addf %11, %163 : vector<16x32xf32>
    %cst_55 = arith.constant dense<0.000000e+00> : vector<16xf32>
    %165 = vector.multi_reduction <add>, %164, %cst_55 [1] : vector<16x32xf32> to vector<16xf32>
    %166 = vector.shape_cast %165 : vector<16xf32> to vector<16x1xf32>
    %cst_56 = arith.constant 3.200000e+01 : f32
    %167 = vector.broadcast %cst_56 : f32 to vector<16x1xf32>
    %168 = arith.divf %166, %167 : vector<16x1xf32>
    %169 = arith.mulf %164, %164 : vector<16x32xf32>
    %cst_57 = arith.constant dense<0.000000e+00> : vector<16xf32>
    %170 = vector.multi_reduction <add>, %169, %cst_57 [1] : vector<16x32xf32> to vector<16xf32>
    %171 = vector.shape_cast %170 : vector<16xf32> to vector<16x1xf32>
    %cst_58 = arith.constant 3.200000e+01 : f32
    %172 = vector.broadcast %cst_58 : f32 to vector<16x1xf32>
    %173 = arith.divf %171, %172 : vector<16x1xf32>
    %174 = arith.mulf %168, %168 : vector<16x1xf32>
    %175 = arith.subf %173, %174 : vector<16x1xf32>
    %cst_59 = arith.constant 9.99999974E-6 : f32
    %176 = vector.broadcast %cst_59 : f32 to vector<16x1xf32>
    %177 = arith.addf %175, %176 : vector<16x1xf32>
    %178 = math.rsqrt %177 : vector<16x1xf32>
    %179 = vector.broadcast %168 : vector<16x1xf32> to vector<16x32xf32>
    %180 = arith.subf %164, %179 : vector<16x32xf32>
    %181 = vector.broadcast %178 : vector<16x1xf32> to vector<16x32xf32>
    %182 = arith.mulf %180, %181 : vector<16x32xf32>
    %183 = vector.broadcast %3 : vector<1x32xf32> to vector<16x32xf32>
    %184 = arith.mulf %182, %183 : vector<16x32xf32>
    %185 = vector.broadcast %4 : vector<1x32xf32> to vector<16x32xf32>
    %186 = arith.addf %184, %185 : vector<16x32xf32>
    %cst_60 = arith.constant dense<0.000000e+00> : vector<16x64xf32>
    %187 = tpu.matmul %186, %9, %cst_60 {dimension_numbers = #tpu.dot_dimension_numbers<[1], [0], [0], [1], [0, 0, 1, 1], [], []>} : vector<16x32xf32>, vector<32x64xf32>, vector<16x64xf32> -> vector<16x64xf32>
    %188 = vector.broadcast %5 : vector<1x64xf32> to vector<16x64xf32>
    %189 = arith.addf %187, %188 : vector<16x64xf32>
    %cst_61 = arith.constant 5.000000e-01 : f32
    %190 = vector.broadcast %cst_61 : f32 to vector<16x64xf32>
    %191 = arith.mulf %190, %189 : vector<16x64xf32>
    %cst_62 = arith.constant 0.707106769 : f32
    %192 = vector.broadcast %cst_62 : f32 to vector<16x64xf32>
    %193 = arith.mulf %189, %192 : vector<16x64xf32>
    %194 = math.absf %193 : vector<16x64xf32>
    %cst_63 = arith.constant 5.000000e-01 : f32
    %195 = vector.broadcast %cst_63 : f32 to vector<16x64xf32>
    %196 = arith.mulf %195, %194 : vector<16x64xf32>
    %cst_64 = arith.constant 1.000000e+00 : f32
    %197 = vector.broadcast %cst_64 : f32 to vector<16x64xf32>
    %198 = arith.addf %197, %196 : vector<16x64xf32>
    %199 = tpu.reciprocal %198 {approx = true} : vector<16x64xf32> -> vector<16x64xf32>
    %cst_65 = arith.constant 0.170872763 : f32
    %200 = vector.broadcast %cst_65 : f32 to vector<16x64xf32>
    %201 = arith.mulf %199, %200 : vector<16x64xf32>
    %cst_66 = arith.constant -0.822152256 : f32
    %202 = vector.broadcast %cst_66 : f32 to vector<16x64xf32>
    %203 = arith.addf %202, %201 : vector<16x64xf32>
    %204 = arith.mulf %199, %203 : vector<16x64xf32>
    %cst_67 = arith.constant 1.48851585 : f32
    %205 = vector.broadcast %cst_67 : f32 to vector<16x64xf32>
    %206 = arith.addf %205, %204 : vector<16x64xf32>
    %207 = arith.mulf %199, %206 : vector<16x64xf32>
    %cst_68 = arith.constant -1.13520396 : f32
    %208 = vector.broadcast %cst_68 : f32 to vector<16x64xf32>
    %209 = arith.addf %208, %207 : vector<16x64xf32>
    %210 = arith.mulf %199, %209 : vector<16x64xf32>
    %cst_69 = arith.constant 0.278868079 : f32
    %211 = vector.broadcast %cst_69 : f32 to vector<16x64xf32>
    %212 = arith.addf %211, %210 : vector<16x64xf32>
    %213 = arith.mulf %199, %212 : vector<16x64xf32>
    %cst_70 = arith.constant -0.186288059 : f32
    %214 = vector.broadcast %cst_70 : f32 to vector<16x64xf32>
    %215 = arith.addf %214, %213 : vector<16x64xf32>
    %216 = arith.mulf %199, %215 : vector<16x64xf32>
    %cst_71 = arith.constant 0.0967841818 : f32
    %217 = vector.broadcast %cst_71 : f32 to vector<16x64xf32>
    %218 = arith.addf %217, %216 : vector<16x64xf32>
    %219 = arith.mulf %199, %218 : vector<16x64xf32>
    %cst_72 = arith.constant 0.374091953 : f32
    %220 = vector.broadcast %cst_72 : f32 to vector<16x64xf32>
    %221 = arith.addf %220, %219 : vector<16x64xf32>
    %222 = arith.mulf %199, %221 : vector<16x64xf32>
    %cst_73 = arith.constant 1.00002372 : f32
    %223 = vector.broadcast %cst_73 : f32 to vector<16x64xf32>
    %224 = arith.addf %223, %222 : vector<16x64xf32>
    %225 = arith.mulf %199, %224 : vector<16x64xf32>
    %cst_74 = arith.constant -1.26551223 : f32
    %226 = vector.broadcast %cst_74 : f32 to vector<16x64xf32>
    %227 = arith.addf %226, %225 : vector<16x64xf32>
    %cst_75 = arith.constant 0.000000e+00 : f32
    %228 = vector.broadcast %cst_75 : f32 to vector<16x64xf32>
    %229 = arith.subf %228, %194 : vector<16x64xf32>
    %230 = arith.mulf %229, %194 : vector<16x64xf32>
    %231 = arith.addf %230, %227 : vector<16x64xf32>
    %232 = math.exp %231 : vector<16x64xf32>
    %233 = arith.mulf %199, %232 : vector<16x64xf32>
    %cst_76 = arith.constant 1.000000e+00 : f32
    %234 = vector.broadcast %cst_76 : f32 to vector<16x64xf32>
    %235 = arith.subf %234, %233 : vector<16x64xf32>
    %cst_77 = arith.constant 0.000000e+00 : f32
    %236 = vector.broadcast %cst_77 : f32 to vector<16x64xf32>
    %237 = arith.cmpf oge, %193, %236 : vector<16x64xf32>
    %cst_78 = arith.constant 0.000000e+00 : f32
    %238 = vector.broadcast %cst_78 : f32 to vector<16x64xf32>
    %239 = arith.subf %238, %235 : vector<16x64xf32>
    %240 = arith.select %237, %235, %239 : vector<16x64xi1>, vector<16x64xf32>
    %cst_79 = arith.constant 1.000000e+00 : f32
    %241 = vector.broadcast %cst_79 : f32 to vector<16x64xf32>
    %242 = arith.addf %241, %240 : vector<16x64xf32>
    %243 = arith.mulf %191, %242 : vector<16x64xf32>
    %cst_80 = arith.constant dense<0.000000e+00> : vector<16x32xf32>
    %244 = tpu.matmul %243, %10, %cst_80 {dimension_numbers = #tpu.dot_dimension_numbers<[1], [0], [0], [1], [0, 0, 1, 1], [], []>} : vector<16x64xf32>, vector<64x32xf32>, vector<16x32xf32> -> vector<16x32xf32>
    %245 = vector.broadcast %6 : vector<1x32xf32> to vector<16x32xf32>
    %246 = arith.addf %244, %245 : vector<16x32xf32>
    %247 = arith.addf %164, %246 : vector<16x32xf32>
    %c0_81 = arith.constant 0 : index
    %c0_82 = arith.constant 0 : index
    %248 = vector.load %arg7[%c0_81, %c0_82] : memref<16x32xf32, #tpu.memory_space<vmem>>, vector<16x32xf32>
    tpu.vector_store %arg7[%c0_81, %c0_82], %247 {strides = array<i32>} : memref<16x32xf32, #tpu.memory_space<vmem>>, vector<16x32xf32>,
    return
  }
  func.func @transform_0(%arg0: i32) -> (i32, i32) {
    %c0_i32 = arith.constant 0 : i32
    %c0_i32_0 = arith.constant 0 : i32
    %c0_i32_1 = arith.constant 0 : i32
    return %c0_i32, %c0_i32_0 : i32, i32
  }
  func.func @transform_1(%arg0: i32) -> (i32, i32) {
    %c0_i32 = arith.constant 0 : i32
    %c0_i32_0 = arith.constant 0 : i32
    %c0_i32_1 = arith.constant 0 : i32
    return %c0_i32, %c0_i32_0 : i32, i32
  }
  func.func @transform_2(%arg0: i32) -> (i32, i32) {
    %c0_i32 = arith.constant 0 : i32
    %c0_i32_0 = arith.constant 0 : i32
    %c0_i32_1 = arith.constant 0 : i32
    return %c0_i32, %c0_i32_0 : i32, i32
  }
  func.func @transform_3(%arg0: i32) -> (i32, i32) {
    %c0_i32 = arith.constant 0 : i32
    %c0_i32_0 = arith.constant 0 : i32
    %c0_i32_1 = arith.constant 0 : i32
    return %c0_i32, %c0_i32_0 : i32, i32
  }
  func.func @transform_4(%arg0: i32) -> (i32, i32) {
    %c0_i32 = arith.constant 0 : i32
    %c0_i32_0 = arith.constant 0 : i32
    %c0_i32_1 = arith.constant 0 : i32
    return %c0_i32, %c0_i32_0 : i32, i32
  }
  func.func @transform_5(%arg0: i32) -> (i32, i32) {
    %c0_i32 = arith.constant 0 : i32
    %c0_i32_0 = arith.constant 0 : i32
    %c0_i32_1 = arith.constant 0 : i32
    return %c0_i32, %c0_i32_0 : i32, i32
  }
  func.func @transform_6(%arg0: i32) -> (i32, i32) {
    %c0_i32 = arith.constant 0 : i32
    %c0_i32_0 = arith.constant 0 : i32
    %c0_i32_1 = arith.constant 0 : i32
    return %c0_i32, %c0_i32_0 : i32, i32
  }
}

</mosaic_0001>

<bundles_post_ra>
// kernel: _encoder_call.1
= control target key start
LH: loop header
LB: loop body
LE: loop exit
PB: predicated region body
PF: predicated region fallthrough
CT: control target
= control target key end

     0   :  { %vm73_vm0 = vcmask 261120   ;;  %s2845_s0 = inlined_call_operand.vmem [shape: f32[16,32], index: 0, kind: input, shape index: {}]   ;;  %s2846_s1 = inlined_call_operand.vmem [shape: f32[32,384], index: 1, kind: input, shape index: {}]   ;;  %s2847_s2 = inlined_call_operand.vmem [shape: f32[128,32], index: 2, kind: input, shape index: {}]   ;;  %s2848_s3 = inlined_call_operand.vmem [shape: f32[32,64], index: 3, kind: input, shape index: {}]   ;;  %s2849_s4 = inlined_call_operand.vmem [shape: f32[64,32], index: 4, kind: input, shape index: {}]   ;;  %s2850_s5 = inlined_call_operand.vmem [shape: f32[8,128], index: 5, kind: input, shape index: {}]   ;;  %s2851_s6 = inlined_call_operand.hbm [shape: f32[16,32], index: 6, kind: output, shape index: {}]  }
   0x1   :  { %v2485_v0 = vld [vmem:[%s2845_s0] sm:$0xff]  ;;  %v2490_v1 = vld [vmem:[%s2845_s0 + $0x8] sm:$0xff] }
   0x2   :  { %11 = vsyncpa [#allocation3], 0  ;;  %v74_v2 = vsel %vm73_vm0, %v2485_v0, 0.0  ;;  %v83_v3 = vmul.f32 %v2485_v0, %v2485_v0  ;;  %v77_v4 = vsel %vm73_vm0, %v2490_v1, 0.0  ;;  %v84_v5 = vmul.f32 %v2490_v1, %v2490_v1  ;;  %v32_v8 = vld [vmem:[%s2846_s1 + $0x8] sm:$0xff]  ;;  %v35_v9 = vld [vmem:[%s2846_s1 + $0x20] sm:$0xff] }
   0x3   :  { %75 = vadd.xlane.f32.xlu0 %v74_v2  ;;  %78 = vadd.xlane.f32.xlu1 %v77_v4  ;;  %v31_v10 = vld [vmem:[%s2846_s1] sm:$0xff]  ;;  %v2272_v11 = vpack.c.bf16 %v35_v9, %v32_v8  ;;  %v34_v12 = vld [vmem:[%s2846_s1 + $0x18] sm:$0xff]  ;;  %v41_v14 = vld [vmem:[%s2846_s1 + $0x50] sm:$0xff]  ;;  %v2439_v15 = vmov 0.0   ;;  %vm2440_vm1 = vmmov 0   ;;  %s2441_s26 = smov 96  }
   0x4   :  { %v85_v6 = vsel %vm73_vm0, %v83_v3, 0.0  ;;  %v88_v7 = vsel %vm73_vm0, %v84_v5, 0.0  ;;  %v38_v13 = vld [vmem:[%s2846_s1 + $0x38] sm:$0xff]  ;;  %187 = vmatprep.mubr.f32.mxu0 %v2439_v15  ;;  %v2274_v16 = vpack.c.bf16 %v34_v12, %v31_v10  ;;  %v37_v18 = vld [vmem:[%s2846_s1 + $0x30] sm:$0xff]  ;;  %v40_v19 = vld [vmem:[%s2846_s1 + $0x48] sm:$0xff]  ;;  %s2442_s27 = smov 64  }
   0x5   :  { %v2276_v17 = vpack.c.bf16 %v41_v14, %v38_v13  ;;  %2273 = vmatprep.subr.bf16.mxu0 %v2272_v11  ;;  %v2278_v20 = vpack.c.bf16 %v40_v19, %v37_v18  ;;  %v33_v21 = vld [vmem:[%s2846_s1 + $0x10] sm:$0xff]  ;;  %v36_v22 = vld [vmem:[%s2846_s1 + $0x28] sm:$0xff]  ;;  %v39_v23 = vld [vmem:[%s2846_s1 + $0x40] sm:$0xff]  ;;  %s2443_s28 = smov 32   ;;  %vm351_vm2 = vcmask 64512   ;;  %vm945_vm3 = vcmask 523264  }
   0x6   :  { %2275 = vmatpush1.bf16.msra.mxu0 %v2274_v16  ;;  %v2280_v24 = vpack.c.bf16 %v36_v22, %v33_v21  ;;  %v42_v25 = vld [vmem:[%s2846_s1 + $0x58] sm:$0xff]  ;;  %v2005_v44 = vld [vmem:[%s2850_s5] ss:$0 sm:$0xff]  ;;  %v2006_v47 = vld [vmem:[%s2850_s5 + $0x1] ss:$0 sm:$0xff]  ;;  %vm947_vm4 = vcmask 785408  }
   0x7   :  { %86 = vadd.xlane.f32.xlu0 %v85_v6  ;;  %89 = vadd.xlane.f32.xlu1 %v88_v7  ;;  %v2284_v26 = vpack.c.bf16 %v42_v25, %v39_v23  ;;  %s2444_s15 = smov [#allocation2]  }
   0x8   :  { %2277 = vmatprep.subr.bf16.mxu0 %v2276_v17  ;;  %2281 = vmatprep.subr.bf16.mxu1 %v2280_v24  ;;  %s1994_s16 = sshll.u32 %s2444_s15, 4  ;;  %s1995_s16 = int_to_ptr.vmem [resolvable:$true] %s1994_s16 }
   0x9   :  { %2283 = vmatpush3.bf16.msra.mxu1 %v2280_v24  ;;  %s2415_s17 = scalar_lea.vmem %s1995_s16, 256  ;;  %p2420_p1 = scmp.lt.s32.totalorder %s1995_s16, %s1995_s16 }
   0xa   :  { %2279 = vmatpush1.bf16.msra.mxu0 %v2278_v20  ;;  %2285 = vmatprep.subr.bf16.mxu1 %v2284_v26  ;;  %p2416_p0 = scmp.ne.s32.totalorder %s1995_s16, %s2415_s17  ;;  %p2421_p2 = scmp.lt.s32.totalorder %s2415_s17, %s2415_s17 }
   0xb   :  { %2132 = vmatprep.subr.mxu0 %v2439_v15 }
   0xc   :  { %p2422_p3 = por %p2421_p2, %p2420_p1 }
   0xd   :  { %2287 = vmatpush3.bf16.msra.mxu1 %v2284_v26 }
   0xe   :  { %2127 = vmatprep.subr.mxu1 %v2439_v15  ;;  %p2423_p4 = pnand %p2422_p3, %p2416_p0 }
  0x90   :  { %v76_v27 = vpop.xlane.xlu0 %75  ;;  %v79_v28 = vpop.xlane.xlu1 %78 }
  0x91   :  { %v81_v29 = vmul.f32 0.03125, %v76_v27  ;;  %v82_v30 = vmul.f32 0.03125, %v79_v28 }
  0x93   :  { %v94_v31 = vmul.f32 %v82_v30, %v82_v30  ;;  %v93_v34 = vmul.f32 %v81_v29, %v81_v29  ;;  %v102_v41 = vsub.f32 %v2490_v1, %v82_v30  ;;  %v101_v42 = vsub.f32 %v2485_v0, %v81_v29 }
  0x94   :  { %v87_v32 = vpop.xlane.xlu0 %86  ;;  %v90_v33 = vpop.xlane.xlu1 %89 }
  0x95   :  { %v91_v35 = vmul.f32 0.03125, %v87_v32  ;;  %v92_v36 = vmul.f32 0.03125, %v90_v33 }
  0x97   :  { %v95_v37 = vsub.f32 %v91_v35, %v93_v34  ;;  %v96_v38 = vsub.f32 %v92_v36, %v94_v31 }
  0x99   :  { %v97_v39 = vadd.f32 1e-05, %v95_v37  ;;  %v98_v40 = vadd.f32 1e-05, %v96_v38 }
  0x9b   :  { %2367 = vrsqrt.f32 %v97_v39 }
  0x9c   :  { %2369 = vrsqrt.f32 %v98_v40 }
  0xa5   :  { %v2368_v43 = vpop.eup %2367 }
  0xa6   :  { %v2370_v45 = vpop.eup %2369  ;;  %v103_v46 = vmul.f32 %v2368_v43, %v101_v42 }
  0xa7   :  { %v104_v48 = vmul.f32 %v2370_v45, %v102_v41 }
  0xa8   :  { %v109_v49 = vmul.f32 %v2005_v44, %v103_v46 }
  0xa9   :  { %v110_v50 = vmul.f32 %v2005_v44, %v104_v48 }
  0xaa   :  { %v115_v51 = vadd.f32 %v2006_v47, %v109_v49 }
  0xab   :  { %v116_v52 = vadd.f32 %v2006_v47, %v110_v50 }
  0xac   :  { %2007 = vmatmul.mubr.msk.f32.vlgmr.msra.gmra.mrb[0].mxu0 %vm73_vm0, %v115_v51  ;;  %2124 = vmatprep.mubr.msk.f32.mxu1 %vm73_vm0, %v115_v51 }
  0xad   :  { %193 = vmatprep.mubr.f32.mxu0 %v2439_v15  ;;  %2125 = vmatmul.mubr.msk.f32.vlgmr.msra.gmra.mrb[0].mxu1 %vm73_vm0, %v116_v52 }
  0xae   :  { %2129 = vmatprep.mubr.msk.f32.mxu1 %vm2440_vm1, %v2439_v15 }
  0xb0   :  { %2008 = vmatmul.mubr.msk.f32.gmra.mrb[2].mxu0 %vm73_vm0, %v116_v52 }
  0xb1   :  { %2134 = vmatprep.mubr.msk.f32.mxu0 %vm2440_vm1, %v2439_v15 }
 0x17f   :  { %v189_v53 = vpop.f32.mrb[0].mxu0 }
 0x180   :  { %436 = vrot.lane.b32.xlu1 %v189_v53, %s2441_s26  ;;  %v191_v54 = vpop.f32.mrb[1].mxu0  ;;  %v2559_v55 = vpop.f32.mrb[0].mxu1 }
 0x181   :  { %438 = vrot.lane.b32.xlu0 %v191_v54, %s2441_s26  ;;  %2128 = vmatpush3.xpose.msk.msra.mxu1 %vm73_vm0, %v191_v54  ;;  %v2563_v56 = vpop.f32.mrb[1].mxu1 }
 0x182   :  { %2133 = vmatpush3.msra.mxu0 %v2563_v56  ;;  %2137 = vmatprep.subr.mxu1 %v2439_v15 }
 0x183   :  { %v195_v57 = vpop.f32.mrb[2].mxu0  ;;  %2142 = vmatprep.subr.mxu0 %v2439_v15 }
 0x184   :  { %604 = vrot.lane.b32.xlu1 %v191_v54, %s2442_s27  ;;  %2130 = vmatmul.mubr.msk.f32.vlgmr.msra.gmra.mrb[2].mxu1 %vm73_vm0, %v189_v53  ;;  %v197_v58 = vpop.f32.mrb[3].mxu0 }
 0x185   :  { %769 = vrot.lane.b32.xlu0 %v191_v54, %s2443_s28  ;;  %2139 = vmatprep.mubr.msk.f32.mxu1 %vm2440_vm1, %v2439_v15 }
 0x188   :  { %602 = vrot.lane.b32.xlu1 %v189_v53, %s2442_s27 }
 0x189   :  { %1111 = vrot.lane.b32.xlu0 %v197_v58, %s2441_s26 }
 0x18c   :  { %767 = vrot.lane.b32.xlu1 %v189_v53, %s2443_s28 }
 0x18d   :  { %1277 = vrot.lane.b32.xlu0 %v197_v58, %s2442_s27 }
 0x190   :  { %1109 = vrot.lane.b32.xlu1 %v195_v57, %s2441_s26 }
 0x191   :  { %1442 = vrot.lane.b32.xlu0 %v197_v58, %s2443_s28 }
 0x194   :  { %1275 = vrot.lane.b32.xlu1 %v195_v57, %s2442_s27 }
 0x198   :  { %1440 = vrot.lane.b32.xlu1 %v195_v57, %s2443_s28 }
 0x1f2   :  { %v437_v59 = vpop.permute.xlu1 %436 }
 0x1f3   :  { %v439_v60 = vpop.permute.xlu0 %438 }
 0x1f4   :  { %2138 = vmatpush3.xpose.msk.msra.mxu1 %vm73_vm0, %v439_v60 }
 0x1f5   :  { %2147 = vmatprep.subr.mxu1 %v2439_v15 }
 0x1f6   :  { %v605_v61 = vpop.permute.xlu1 %604 }
 0x1f7   :  { %2140 = vmatmul.mubr.msk.f32.vlgmr.msra.gmra.mrb[4].mxu1 %vm73_vm0, %v437_v59  ;;  %v770_v62 = vpop.permute.xlu0 %769 }
 0x1f8   :  { %2148 = vmatpush3.xpose.msk.msra.mxu1 %vm73_vm0, %v605_v61  ;;  %2149 = vmatprep.mubr.msk.f32.mxu1 %vm2440_vm1, %v2439_v15 }
 0x1f9   :  { %2157 = vmatprep.subr.mxu1 %v2439_v15 }
 0x1fa   :  { %v603_v63 = vpop.permute.xlu1 %602 }
 0x1fb   :  { %2150 = vmatmul.mubr.msk.f32.vlgmr.msra.gmra.mrb[6].mxu1 %vm73_vm0, %v603_v63  ;;  %v1112_v2 = vpop.permute.xlu0 %1111 }
 0x1fc   :  { %2158 = vmatpush3.xpose.msk.msra.mxu1 %vm73_vm0, %v770_v62  ;;  %2159 = vmatprep.mubr.msk.f32.mxu1 %vm2440_vm1, %v2439_v15 }
 0x1fd   :  { %2167 = vmatprep.subr.mxu1 %v2439_v15 }
 0x1fe   :  { %v768_v3 = vpop.permute.xlu1 %767 }
 0x1ff   :  { %2160 = vmatmul.mubr.msk.f32.vlgmr.msra.gmra.mrb[8].mxu1 %vm73_vm0, %v768_v3  ;;  %v1278_v5 = vpop.permute.xlu0 %1277 }
 0x200   :  { %2168 = vmatpush3.xpose.msk.msra.mxu1 %vm73_vm0, %v197_v58  ;;  %2169 = vmatprep.mubr.msk.f32.mxu1 %vm2440_vm1, %v2439_v15 }
 0x201   :  { %2177 = vmatprep.subr.mxu1 %v2439_v15 }
 0x202   :  { %v1110_v4 = vpop.permute.xlu1 %1109 }
 0x203   :  { %2170 = vmatmul.mubr.msk.f32.vlgmr.msra.gmra.mrb[10].mxu1 %vm73_vm0, %v195_v57  ;;  %v1443_v7 = vpop.permute.xlu0 %1442 }
 0x204   :  { %2178 = vmatpush3.xpose.msk.msra.mxu1 %vm73_vm0, %v1112_v2  ;;  %2179 = vmatprep.mubr.msk.f32.mxu1 %vm2440_vm1, %v2439_v15 }
 0x205   :  { %2187 = vmatprep.subr.mxu1 %v2439_v15 }
 0x206   :  { %v1276_v6 = vpop.permute.xlu1 %1275 }
 0x207   :  { %2180 = vmatmul.mubr.msk.f32.vlgmr.msra.gmra.mrb[12].mxu1 %vm73_vm0, %v1110_v4 }
 0x208   :  { %2188 = vmatpush3.xpose.msk.msra.mxu1 %vm73_vm0, %v1278_v5  ;;  %2189 = vmatprep.mubr.msk.f32.mxu1 %vm2440_vm1, %v2439_v15 }
 0x209   :  { %2197 = vmatprep.subr.mxu1 %v2439_v15 }
 0x20a   :  { %v1441_v8 = vpop.permute.xlu1 %1440 }
 0x20b   :  { %2190 = vmatmul.mubr.msk.f32.vlgmr.msra.gmra.mrb[14].mxu1 %vm73_vm0, %v1276_v6 }
 0x20c   :  { %2198 = vmatpush3.xpose.msk.msra.mxu1 %vm73_vm0, %v1443_v7  ;;  %2199 = vmatprep.mubr.msk.f32.mxu1 %vm2440_vm1, %v2439_v15 }
 0x20f   :  { %2200 = vmatmul.mubr.msk.f32.vlgmr.msra.gmra.mrb[16].mxu1 %vm73_vm0, %v1441_v8 }
 0x257   :  { %v347_v9 = vpop.f32.mrb[2].mxu1 }
 0x258   :  { %v2131_v10 = vpop.f32.mrb[3].mxu1  ;;  %v352_v11 = vsel %vm351_vm2, %v347_v9, -inf }
 0x259   :  { %353 = vmax.xlane.f32.xlu0 %v352_v11 }
 0x2ca   :  { %v510_v12 = vpop.f32.mrb[4].mxu1 }
 0x2cb   :  { %v2141_v13 = vpop.f32.mrb[5].mxu1  ;;  %v514_v14 = vsel %vm351_vm2, %v510_v12, -inf }
 0x2cc   :  { %515 = vmax.xlane.f32.xlu1 %v514_v14 }
 0x2ce   :  { %v676_v16 = vpop.f32.mrb[6].mxu1 }
 0x2cf   :  { %v2151_v17 = vpop.f32.mrb[7].mxu1  ;;  %v680_v18 = vsel %vm351_vm2, %v676_v16, -inf }
 0x2d0   :  { %681 = vmax.xlane.f32.xlu0 %v680_v18 }
 0x2d2   :  { %v841_v19 = vpop.f32.mrb[8].mxu1 }
 0x2d3   :  { %v2161_v20 = vpop.f32.mrb[9].mxu1  ;;  %v845_v21 = vsel %vm351_vm2, %v841_v19, -inf }
 0x2d4   :  { %846 = vmax.xlane.f32.xlu0 %v845_v21 }
 0x2d6   :  { %v1021_v22 = vpop.f32.mrb[10].mxu1 }
 0x2d7   :  { %v2171_v23 = vpop.f32.mrb[11].mxu1  ;;  %v1025_v24 = vsel %vm351_vm2, %v1021_v22, -inf }
 0x2d8   :  { %1026 = vmax.xlane.f32.xlu0 %v1025_v24 }
 0x2da   :  { %v1183_v25 = vpop.f32.mrb[12].mxu1 }
 0x2db   :  { %v1187_v26 = vsel %vm351_vm2, %v1183_v25, -inf  ;;  %v2181_v27 = vpop.f32.mrb[13].mxu1 }
 0x2dc   :  { %1188 = vmax.xlane.f32.xlu1 %v1187_v26 }
 0x2de   :  { %v1349_v28 = vpop.f32.mrb[14].mxu1 }
 0x2df   :  { %v1353_v29 = vsel %vm351_vm2, %v1349_v28, -inf  ;;  %v2191_v30 = vpop.f32.mrb[15].mxu1 }
 0x2e0   :  { %1354 = vmax.xlane.f32.xlu0 %v1353_v29 }
 0x2e2   :  { %v1514_v31 = vpop.f32.mrb[16].mxu1 }
 0x2e3   :  { %v1518_v32 = vsel %vm351_vm2, %v1514_v31, -inf  ;;  %v2201_v33 = vpop.f32.mrb[17].mxu1 }
 0x2e4   :  { %1519 = vmax.xlane.f32.xlu1 %v1518_v32 }
 0x2e6   :  { %v354_v34 = vpop.xlane.xlu0 %353 }
 0x2e7   :  { %v355_v35 = vsub.f32 %v347_v9, %v354_v34 }
 0x2e9   :  { %v356_v36 = vmul.f32 1.442695, %v355_v35 }
 0x2eb   :  { %2371 = vpow2.f32 %v356_v36 }
 0x2f5   :  { %v2372_v37 = vpop.eup %2371 }
 0x2f6   :  { %v358_v38 = vsel %vm351_vm2, %v2372_v37, 0.0 }
 0x2f7   :  { %359 = vadd.xlane.f32.xlu0 %v358_v38 }
 0x359   :  { %v516_v39 = vpop.xlane.xlu1 %515 }
 0x35a   :  { %v517_v40 = vsub.f32 %v510_v12, %v516_v39 }
 0x35c   :  { %v518_v41 = vmul.f32 1.442695, %v517_v40 }
 0x35d   :  { %v682_v42 = vpop.xlane.xlu0 %681 }
 0x35e   :  { %2373 = vpow2.f32 %v518_v41  ;;  %v683_v43 = vsub.f32 %v676_v16, %v682_v42 }
 0x360   :  { %v684_v44 = vmul.f32 1.442695, %v683_v43 }
 0x361   :  { %v847_v49 = vpop.xlane.xlu0 %846 }
 0x362   :  { %2375 = vpow2.f32 %v684_v44  ;;  %v848_v57 = vsub.f32 %v841_v19, %v847_v49 }
 0x364   :  { %v849_v62 = vmul.f32 1.442695, %v848_v57 }
 0x365   :  { %v1027_v50 = vpop.xlane.xlu0 %1026 }
 0x366   :  { %v1028_v53 = vsub.f32 %v1021_v22, %v1027_v50  ;;  %v47_v50 = vld [vmem:[%s2847_s2 + $0x20] sm:$0xff] }
 0x368   :  { %v2374_v45 = vpop.eup %2373  ;;  %v1029_v59 = vmul.f32 1.442695, %v1028_v53  ;;  %v49_v53 = vld [vmem:[%s2847_s2 + $0x30] sm:$0xff] }
 0x369   :  { %v520_v46 = vsel %vm351_vm2, %v2374_v45, 0.0  ;;  %v1189_v61 = vpop.xlane.xlu1 %1188 }
 0x36a   :  { %521 = vadd.xlane.f32.xlu1 %v520_v46  ;;  %v1190_v63 = vsub.f32 %v1183_v25, %v1189_v61  ;;  %v44_v46 = vld [vmem:[%s2847_s2 + $0x8] sm:$0xff] }
 0x36c   :  { %v2623_v47 = vpop.eup %2375 }
 0x36d   :  { %v686_v48 = vsel %vm351_vm2, %v2623_v47, 0.0  ;;  %v1355_v51 = vpop.xlane.xlu0 %1354 }
 0x36e   :  { %687 = vadd.xlane.f32.xlu0 %v686_v48  ;;  %v1356_v60 = vsub.f32 %v1349_v28, %v1355_v51  ;;  %v46_v48 = vld [vmem:[%s2847_s2 + $0x18] sm:$0xff]  ;;  %v48_v51 = vld [vmem:[%s2847_s2 + $0x28] sm:$0xff] }
 0x370   :  { %v1357_v2 = vmul.f32 1.442695, %v1356_v60 }
 0x371   :  { %v1520_v3 = vpop.xlane.xlu1 %1519 }
 0x372   :  { %v1521_v4 = vsub.f32 %v1514_v31, %v1520_v3  ;;  %v53_v3 = vld [vmem:[%s2847_s2 + $0x50] sm:$0xff] }
 0x374   :  { %v1522_v5 = vmul.f32 1.442695, %v1521_v4 }
 0x37b   :  { %691 = vrot.lane.b32.xlu1 %v2563_v56, %s2442_s27 }
 0x37f   :  { %856 = vrot.lane.b32.xlu1 %v2563_v56, %s2443_s28 }
 0x383   :  { %1199 = vrot.lane.b32.xlu1 %v2559_v55, %s2441_s26 }
 0x384   :  { %526 = vrot.lane.b32.xlu0 %v2563_v56, %s2441_s26  ;;  %v360_v52 = vpop.xlane.xlu0 %359  ;;  %v1191_v56 = vmul.f32 1.442695, %v1190_v63 }
 0x385   :  { %2377 = vrcp.f32 %v360_v52  ;;  %v2296_v52 = vpack.c.bf16 %v48_v51, %v47_v50  ;;  %v60_v50 = vld [vmem:[%s2848_s3 + $0x8] sm:$0xff]  ;;  %v61_v51 = vld [vmem:[%s2848_s3 + $0x10] sm:$0xff] }
 0x386   :  { %2379 = vpow2.f32 %v1029_v59  ;;  %v52_v59 = vld [vmem:[%s2847_s2 + $0x48] sm:$0xff] }
 0x387   :  { %2381 = vpow2.f32 %v849_v62 }
 0x388   :  { %2383 = vpow2.f32 %v1357_v2 }
 0x389   :  { %2385 = vpow2.f32 %v1191_v56  ;;  %v54_v56 = vld [vmem:[%s2847_s2 + $0x58] sm:$0xff] }
 0x38a   :  { %2387 = vpow2.f32 %v1522_v5  ;;  %v2308_v4 = vpack.c.bf16 %v54_v56, %v53_v3 }
 0x38f   :  { %v2378_v54 = vpop.eup %2377 }
 0x390   :  { %v362_v58 = vmul.f32 %v2378_v54, %v2372_v37  ;;  %v2380_v6 = vpop.eup %2379  ;;  %v50_v54 = vld [vmem:[%s2847_s2 + $0x38] sm:$0xff] }
 0x391   :  { %v2382_v7 = vpop.eup %2381  ;;  %v1031_v8 = vsel %vm351_vm2, %v2380_v6, 0.0  ;;  %v2300_v57 = vpack.c.bf16 %v50_v54, %v49_v53  ;;  %v62_v53 = vld [vmem:[%s2848_s3 + $0x18] sm:$0xff] }
 0x392   :  { %2135 = vmatmul.mubr.msk.f32.vlgmr.msra.gmra.mrb[4].mxu0 %vm351_vm2, %v362_v58  ;;  %v2639_v9 = vpop.eup %2383  ;;  %v851_v11 = vsel %vm351_vm2, %v2382_v7, 0.0  ;;  %v51_v58 = vld [vmem:[%s2847_s2 + $0x40] sm:$0xff]  ;;  %v2324_v54 = vpack.c.bf16 %v62_v53, %v61_v51 }
 0x393   :  { %2144 = vmatprep.mubr.msk.f32.mxu0 %vm2440_vm1, %v2439_v15  ;;  %v1359_v10 = vsel %vm351_vm2, %v2639_v9, 0.0  ;;  %v2386_v12 = vpop.eup %2385  ;;  %v2304_v60 = vpack.c.bf16 %v52_v59, %v51_v58 }
 0x394   :  { %v1193_v13 = vsel %vm351_vm2, %v2386_v12, 0.0  ;;  %v2645_v14 = vpop.eup %2387 }
 0x395   :  { %v1524_v16 = vsel %vm351_vm2, %v2645_v14, 0.0 }
 0x3a3   :  { %1032 = vadd.xlane.f32.xlu0 %v1031_v8 }
 0x3a7   :  { %1360 = vadd.xlane.f32.xlu0 %v1359_v10  ;;  %852 = vadd.xlane.f32.xlu1 %v851_v11  ;;  %v57_v11 = vld [vmem:[%s2847_s2 + $0x70] sm:$0xff] }
 0x3ab   :  { %1194 = vadd.xlane.f32.xlu1 %v1193_v13 }
 0x3af   :  { %1525 = vadd.xlane.f32.xlu1 %v1524_v16 }
 0x3bd   :  { %1364 = vrot.lane.b32.xlu0 %v2559_v55, %s2442_s27 }
 0x3c0   :  { %1529 = vrot.lane.b32.xlu1 %v2559_v55, %s2443_s28 }
 0x3f7   :  { %v522_v17 = vpop.xlane.xlu1 %521 }
 0x3f8   :  { %2389 = vrcp.f32 %v522_v17 }
 0x3fb   :  { %v688_v18 = vpop.xlane.xlu0 %687  ;;  %v692_v22 = vpop.permute.xlu1 %691 }
 0x3fc   :  { %2391 = vrcp.f32 %v688_v18 }
 0x3ff   :  { %v527_v19 = vpop.permute.xlu0 %526  ;;  %v857_v25 = vpop.permute.xlu1 %856 }
 0x400   :  { %2143 = vmatpush3.msra.mxu0 %v527_v19 }
 0x401   :  { %2152 = vmatprep.subr.mxu0 %v2439_v15 }
 0x402   :  { %v2390_v20 = vpop.eup %2389 }
 0x403   :  { %v524_v21 = vmul.f32 %v2390_v20, %v2374_v45  ;;  %v1200_v26 = vpop.permute.xlu1 %1199  ;;  %v43_v45 = vld [vmem:[%s2847_s2] sm:$0xff] }
 0x405   :  { %2145 = vmatmul.mubr.msk.f32.vlgmr.msra.gmra.mrb[6].mxu0 %vm351_vm2, %v524_v21 }
 0x406   :  { %v2392_v23 = vpop.eup %2391  ;;  %2153 = vmatpush3.msra.mxu0 %v692_v22  ;;  %2154 = vmatprep.mubr.msk.f32.mxu0 %vm2440_vm1, %v2439_v15 }
 0x407   :  { %v690_v24 = vmul.f32 %v2392_v23, %v2623_v47  ;;  %2162 = vmatprep.subr.mxu0 %v2439_v15  ;;  %v45_v47 = vld [vmem:[%s2847_s2 + $0x10] sm:$0xff] }
 0x408   :  { %v2292_v49 = vpack.c.bf16 %v46_v48, %v45_v47 }
 0x409   :  { %2155 = vmatmul.mubr.msk.f32.vlgmr.msra.gmra.mrb[8].mxu0 %vm351_vm2, %v690_v24 }
 0x40a   :  { %2163 = vmatpush3.msra.mxu0 %v857_v25  ;;  %2164 = vmatprep.mubr.msk.f32.mxu0 %vm2440_vm1, %v2439_v15 }
 0x40b   :  { %2172 = vmatprep.subr.mxu0 %v2439_v15 }
 0x430   :  { %v1033_v28 = vpop.xlane.xlu0 %1032 }
 0x434   :  { %v853_v27 = vpop.xlane.xlu1 %852  ;;  %v1361_v30 = vpop.xlane.xlu0 %1360 }
 0x435   :  { %2393 = vrcp.f32 %v853_v27 }
 0x436   :  { %2395 = vrcp.f32 %v1033_v28 }
 0x438   :  { %v1195_v29 = vpop.xlane.xlu1 %1194  ;;  %v1365_v39 = vpop.permute.xlu0 %1364 }
 0x439   :  { %2397 = vrcp.f32 %v1195_v29 }
 0x43a   :  { %2399 = vrcp.f32 %v1361_v30 }
 0x43c   :  { %v1526_v33 = vpop.xlane.xlu1 %1525 }
 0x43d   :  { %2401 = vrcp.f32 %v1526_v33 }
 0x43f   :  { %v2394_v31 = vpop.eup %2393 }
 0x440   :  { %v855_v32 = vmul.f32 %v2394_v31, %v2382_v7  ;;  %v2396_v34 = vpop.eup %2395  ;;  %v1530_v41 = vpop.permute.xlu1 %1529  ;;  %v56_v7 = vld [vmem:[%s2847_s2 + $0x68] sm:$0xff] }
 0x441   :  { %v1035_v35 = vmul.f32 %v2396_v34, %v2380_v6  ;;  %v55_v6 = vld [vmem:[%s2847_s2 + $0x60] sm:$0xff] }
 0x442   :  { %2165 = vmatmul.mubr.msk.f32.vlgmr.msra.gmra.mrb[10].mxu0 %vm351_vm2, %v855_v32 }
 0x443   :  { %2173 = vmatpush3.msra.mxu0 %v2559_v55  ;;  %2174 = vmatprep.mubr.msk.f32.mxu0 %vm2440_vm1, %v2439_v15  ;;  %v2398_v36 = vpop.eup %2397 }
 0x444   :  { %2182 = vmatprep.subr.mxu0 %v2439_v15  ;;  %v1197_v37 = vmul.f32 %v2398_v36, %v2386_v12  ;;  %v2400_v38 = vpop.eup %2399  ;;  %v58_v12 = vld [vmem:[%s2847_s2 + $0x78] sm:$0xff] }
 0x445   :  { %v1363_v55 = vmul.f32 %v2400_v38, %v2639_v9  ;;  %v2312_v9 = vpack.c.bf16 %v56_v7, %v55_v6 }
 0x446   :  { %2175 = vmatmul.mubr.msk.f32.vlgmr.msra.gmra.mrb[12].mxu0 %vm351_vm2, %v1035_v35 }
 0x447   :  { %2183 = vmatpush3.msra.mxu0 %v1200_v26  ;;  %2184 = vmatprep.mubr.msk.f32.mxu0 %vm2440_vm1, %v2439_v15  ;;  %v2402_v40 = vpop.eup %2401 }
 0x448   :  { %2192 = vmatprep.subr.mxu0 %v2439_v15  ;;  %v1528_v42 = vmul.f32 %v2402_v40, %v2645_v14  ;;  %v2316_v14 = vpack.c.bf16 %v58_v12, %v57_v11  ;;  %v2037_v12 = vld [vmem:[%s2850_s5 + $0x4] ss:$0 sm:$0xff] }
 0x44a   :  { %2185 = vmatmul.mubr.msk.f32.vlgmr.msra.gmra.mrb[14].mxu0 %vm351_vm2, %v1197_v37 }
 0x44b   :  { %2193 = vmatpush3.msra.mxu0 %v1365_v39  ;;  %2194 = vmatprep.mubr.msk.f32.mxu0 %vm2440_vm1, %v2439_v15 }
 0x44c   :  { %2202 = vmatprep.subr.mxu0 %v2439_v15 }
 0x44e   :  { %2195 = vmatmul.mubr.msk.f32.vlgmr.msra.gmra.mrb[16].mxu0 %vm351_vm2, %v1363_v55  ;;  %v2035_v55 = vld [vmem:[%s2850_s5 + $0x2] ss:$0 sm:$0xff] }
 0x44f   :  { %2203 = vmatpush3.msra.mxu0 %v1530_v41  ;;  %2204 = vmatprep.mubr.msk.f32.mxu0 %vm2440_vm1, %v2439_v15  ;;  %v2288_v15 = vpack.c.bf16 %v44_v46, %v43_v45 }
 0x451   :  { %2289 = vmatprep.subr.bf16.mxu1 %v2288_v15 }
 0x452   :  { %2205 = vmatmul.mubr.msk.f32.vlgmr.msra.gmra.mrb[18].mxu0 %vm351_vm2, %v1528_v42  ;;  %2291 = vmatpush3.bf16.msra.mxu1 %v2288_v15 }
 0x453   :  { %2293 = vmatprep.subr.bf16.mxu1 %v2292_v49 }
 0x456   :  { %2295 = vmatpush3.bf16.msra.mxu1 %v2292_v49  ;;  %v59_v49 = vld [vmem:[%s2848_s3] sm:$0xff] }
 0x457   :  { %2297 = vmatprep.subr.bf16.mxu1 %v2296_v52 }
 0x45a   :  { %2299 = vmatpush3.bf16.msra.mxu1 %v2296_v52  ;;  %v2320_v52 = vpack.c.bf16 %v60_v50, %v59_v49 }
 0x45b   :  { %2301 = vmatprep.subr.bf16.mxu1 %v2300_v57 }
 0x45c   :  { %2321 = vmatprep.subr.bf16.mxu0 %v2320_v52 }
 0x45d   :  { %2323 = vmatpush3.bf16.msra.mxu0 %v2320_v52 }
 0x45e   :  { %2303 = vmatpush3.bf16.msra.mxu1 %v2300_v57  ;;  %2325 = vmatprep.subr.bf16.mxu0 %v2324_v54 }
 0x45f   :  { %2305 = vmatprep.subr.bf16.mxu1 %v2304_v60 }
 0x461   :  { %2327 = vmatpush3.bf16.msra.mxu0 %v2324_v54 }
 0x462   :  { %2307 = vmatpush3.bf16.msra.mxu1 %v2304_v60 }
 0x463   :  { %2309 = vmatprep.subr.bf16.mxu1 %v2308_v4 }
 0x465   :  { %v2682_v43 = vpop.f32.mrb[4].mxu0 }
 0x466   :  { %v2136_v44 = vpop.f32.mrb[5].mxu0  ;;  %2311 = vmatpush3.bf16.msra.mxu1 %v2308_v4 }
 0x467   :  { %2313 = vmatprep.subr.bf16.mxu1 %v2312_v9 }
 0x46a   :  { %2315 = vmatpush3.bf16.msra.mxu1 %v2312_v9 }
 0x46b   :  { %2317 = vmatprep.subr.bf16.mxu1 %v2316_v14 }
 0x46e   :  { %2319 = vmatpush3.bf16.msra.mxu1 %v2316_v14 }
 0x4d8   :  { %v598_v61 = vpop.f32.mrb[6].mxu0 }
 0x4d9   :  { %v2146_v62 = vpop.f32.mrb[7].mxu0 }
 0x4dc   :  { %v763_v63 = vpop.f32.mrb[8].mxu0 }
 0x4dd   :  { %v2156_v2 = vpop.f32.mrb[9].mxu0 }
 0x515   :  { %v928_v5 = vpop.f32.mrb[10].mxu0 }
 0x516   :  { %v2166_v8 = vpop.f32.mrb[11].mxu0 }
 0x519   :  { %v1105_v10 = vpop.f32.mrb[12].mxu0 }
 0x51a   :  { %v2176_v13 = vpop.f32.mrb[13].mxu0 }
 0x51d   :  { %v1271_v16 = vpop.f32.mrb[14].mxu0 }
 0x51e   :  { %v2352_v17 = vpack.i.bf16 %v1271_v16, %v598_v61  ;;  %v2186_v18 = vpop.f32.mrb[15].mxu0 }
 0x520   :  { %2353 = vrot.lane.b32.xlu0 %v2352_v17, %s2443_s28 }
 0x521   :  { %v1436_v19 = vpop.f32.mrb[16].mxu0 }
 0x522   :  { %v2357_v20 = vpack.i.bf16 %v1436_v19, %v763_v63  ;;  %v2196_v21 = vpop.f32.mrb[17].mxu0 }
 0x523   :  { %v63_v21 = vld [vmem:[%s2849_s4] sm:$0xff] }
 0x524   :  { %2358 = vrot.lane.b32.xlu1 %v2357_v20, %s2442_s27 }
 0x525   :  { %v1601_v22 = vpop.f32.mrb[18].mxu0 }
 0x526   :  { %v2362_v23 = vpack.i.bf16 %v1601_v22, %v928_v5  ;;  %v2206_v24 = vpop.f32.mrb[19].mxu0  ;;  %v64_v22 = vld [vmem:[%s2849_s4 + $0x8] sm:$0xff] }
 0x527   :  { %v65_v24 = vld [vmem:[%s2849_s4 + $0x10] sm:$0xff] }
 0x528   :  { %2363 = vrot.lane.b32.xlu0 %v2362_v23, %s2441_s26  ;;  %v2328_v23 = vpack.c.bf16 %v64_v22, %v63_v21 }
 0x52a   :  { %2329 = vmatprep.subr.bf16.mxu0 %v2328_v23 }
 0x592   :  { %v2354_v25 = vpop.permute.xlu0 %2353 }
 0x593   :  { %v2356_v27 = vunpack.i.h.bf16 %v2354_v25  ;;  %v2355_v28 = vunpack.i.l.bf16 %v2354_v25  ;;  %v66_v25 = vld [vmem:[%s2849_s4 + $0x18] sm:$0xff] }
 0x595   :  { %v1617_v32 = vsel %vm73_vm0, %v1105_v10, %v2356_v27  ;;  %v944_v35 = vsel %vm73_vm0, %v2682_v43, %v2355_v28  ;;  %v2036_v10 = vld [vmem:[%s2850_s5 + $0x3] ss:$0 sm:$0xff]  ;;  %v68_v28 = vld [vmem:[%s2849_s4 + $0x28] sm:$0xff] }
 0x596   :  { %v2359_v26 = vpop.permute.xlu1 %2358  ;;  %v67_v27 = vld [vmem:[%s2849_s4 + $0x20] sm:$0xff] }
 0x597   :  { %v2361_v29 = vunpack.i.h.bf16 %v2359_v26  ;;  %v2360_v30 = vunpack.i.l.bf16 %v2359_v26  ;;  %v2332_v26 = vpack.c.bf16 %v66_v25, %v65_v24 }
 0x599   :  { %v946_v36 = vsel %vm945_vm3, %v944_v35, %v2360_v30  ;;  %v1618_v37 = vsel %vm945_vm3, %v1617_v32, %v2361_v29  ;;  %v2336_v29 = vpack.c.bf16 %v68_v28, %v67_v27  ;;  %v69_v30 = vld [vmem:[%s2849_s4 + $0x30] sm:$0xff] }
 0x59a   :  { %v2364_v31 = vpop.permute.xlu0 %2363 }
 0x59b   :  { %v2366_v33 = vunpack.i.h.bf16 %v2364_v31  ;;  %v2365_v34 = vunpack.i.l.bf16 %v2364_v31  ;;  %v70_v31 = vld [vmem:[%s2849_s4 + $0x38] sm:$0xff] }
 0x59c   :  { %v2340_v32 = vpack.c.bf16 %v70_v31, %v69_v30 }
 0x59d   :  { %v948_v38 = vsel %vm947_vm4, %v946_v36, %v2365_v34  ;;  %v1619_v39 = vsel %vm947_vm4, %v1618_v37, %v2366_v33  ;;  %v2038_v33 = vld [vmem:[%s2850_s5 + $0x5] ss:$0 sm:$0xff] }
 0x59e   :  { %2239 = vmatprep.mubr.f32.mxu1 %v948_v38 }
 0x59f   :  { %2240 = vmatmul.mubr.f32.vlgmr.msra.gmra.mrb[18].mxu1 %v1619_v39 }
 0x672   :  { %v2241_v40 = vpop.f32.mrb[18].mxu1 }
 0x673   :  { %v1696_v41 = vadd.f32 %v2241_v40, %v2035_v55  ;;  %v1690_v42 = vpop.f32.mrb[19].mxu1 }
 0x674   :  { %v1691_v44 = vadd.f32 %v2035_v55, %v1690_v42 }
 0x675   :  { %v2744_v45 = vadd.f32 %v1696_v41, %v2490_v1 }
 0x676   :  { %v2747_v43 = vadd.f32 %v1691_v44, %v2485_v0 }
 0x677   :  { %v1704_v46 = vsel %vm73_vm0, %v2744_v45, 0.0  ;;  %v1710_v1 = vmul.f32 %v2744_v45, %v2744_v45 }
 0x678   :  { %1705 = vadd.xlane.f32.xlu0 %v1704_v46  ;;  %v1701_v47 = vsel %vm73_vm0, %v2747_v43, 0.0  ;;  %v1709_v15 = vmul.f32 %v2747_v43, %v2747_v43 }
 0x679   :  { %1702 = vadd.xlane.f32.xlu1 %v1701_v47  ;;  %v1714_v0 = vsel %vm73_vm0, %v1710_v1, 0.0 }
 0x67a   :  { %v1711_v48 = vsel %vm73_vm0, %v1709_v15, 0.0 }
 0x67c   :  { %1712 = vadd.xlane.f32.xlu0 %v1711_v48 }
 0x680   :  { %1715 = vadd.xlane.f32.xlu0 %v1714_v0 }
 0x705   :  { %v1706_v57 = vpop.xlane.xlu0 %1705 }
 0x706   :  { %v1703_v58 = vpop.xlane.xlu1 %1702  ;;  %v1708_v62 = vmul.f32 0.03125, %v1706_v57 }
 0x707   :  { %v1707_v59 = vmul.f32 0.03125, %v1703_v58 }
 0x708   :  { %v1720_v56 = vmul.f32 %v1708_v62, %v1708_v62  ;;  %v1728_v13 = vsub.f32 %v2744_v45, %v1708_v62 }
 0x709   :  { %v1719_v60 = vmul.f32 %v1707_v59, %v1707_v59  ;;  %v1713_v61 = vpop.xlane.xlu0 %1712  ;;  %v1727_v8 = vsub.f32 %v2747_v43, %v1707_v59 }
 0x70a   :  { %v1717_v63 = vmul.f32 0.03125, %v1713_v61 }
 0x70c   :  { %v1721_v2 = vsub.f32 %v1717_v63, %v1719_v60 }
 0x70d   :  { %v1716_v3 = vpop.xlane.xlu0 %1715 }
 0x70e   :  { %v1723_v4 = vadd.f32 1e-05, %v1721_v2  ;;  %v1718_v5 = vmul.f32 0.03125, %v1716_v3 }
 0x710   :  { %2403 = vrsqrt.f32 %v1723_v4  ;;  %v1722_v6 = vsub.f32 %v1718_v5, %v1720_v56 }
 0x712   :  { %v1724_v7 = vadd.f32 1e-05, %v1722_v6 }
 0x714   :  { %2405 = vrsqrt.f32 %v1724_v7 }
 0x71a   :  { %v2404_v9 = vpop.eup %2403 }
 0x71b   :  { %v1729_v11 = vmul.f32 %v2404_v9, %v1727_v8 }
 0x71d   :  { %v1735_v14 = vmul.f32 %v2036_v10, %v1729_v11 }
 0x71e   :  { %v2406_v16 = vpop.eup %2405 }
 0x71f   :  { %v1730_v17 = vmul.f32 %v2406_v16, %v1728_v13  ;;  %v1741_v18 = vadd.f32 %v2037_v12, %v1735_v14 }
 0x721   :  { %v1736_v19 = vmul.f32 %v2036_v10, %v1730_v17  ;;  %2250 = vmatprep.mubr.msk.f32.mxu0 %vm73_vm0, %v1741_v18 }
 0x723   :  { %v1742_v20 = vadd.f32 %v2037_v12, %v1736_v19 }
 0x725   :  { %2251 = vmatmul.mubr.msk.f32.vlgmr.msra.gmra.mrb[20].mxu0 %vm73_vm0, %v1742_v20 }
 0x726   :  { %2331 = vmatpush3.bf16.msra.mxu0 %v2328_v23 }
 0x727   :  { %2333 = vmatprep.subr.bf16.mxu0 %v2332_v26 }
 0x72a   :  { %2335 = vmatpush3.bf16.msra.mxu0 %v2332_v26 }
 0x72b   :  { %2337 = vmatprep.subr.bf16.mxu0 %v2336_v29 }
 0x72e   :  { %2339 = vmatpush3.bf16.msra.mxu0 %v2336_v29 }
 0x72f   :  { %2341 = vmatprep.subr.bf16.mxu0 %v2340_v32 }
 0x732   :  { %2343 = vmatpush3.bf16.msra.mxu0 %v2340_v32 }
 0x7f8   :  { %v2252_v34 = vpop.f32.mrb[20].mxu0 }
 0x7f9   :  { %v2808_v35 = vadd.f32 %v2252_v34, %v2038_v33  ;;  %v1819_v36 = vpop.f32.mrb[21].mxu0 }
 0x7fa   :  { %v2810_v37 = vadd.f32 %v2038_v33, %v1819_v36 }
 0x7fb   :  { %v2813_v38 = vmul.f32 0.70710677, %v2808_v35 }
 0x7fc   :  { %v2816_v39 = vmul.f32 0.70710677, %v2810_v37 }
 0x7fd   :  { %v1833_v55 = vand.u32 2147483647, %v2813_v38  ;;  %vm1891_vm5 = vcmp.ge.f32.partialorder %v2813_v38, 0.0  ;;  %v2041_v38 = vld [vmem:[%s2850_s5 + $0x6] ss:$0 sm:$0xff] }
 0x7fe   :  { %v1832_v40 = vand.u32 2147483647, %v2816_v39  ;;  %vm1890_vm6 = vcmp.ge.f32.partialorder %v2816_v39, 0.0 }
 0x7ff   :  { %v1835_v41 = vmul.f32 0.5, %v1833_v55  ;;  %v1877_v17 = vsub.f32 0.0, %v1833_v55 }
 0x800   :  { %v1834_v42 = vmul.f32 0.5, %v1832_v40  ;;  %v1876_v19 = vsub.f32 0.0, %v1832_v40 }
 0x801   :  { %v1837_v44 = vadd.f32 1.0, %v1835_v41  ;;  %v1879_v23 = vmul.f32 %v1877_v17, %v1833_v55  ;;  %v1829_v55 = vmul.f32 0.5, %v2808_v35 }
 0x802   :  { %v1836_v46 = vadd.f32 1.0, %v1834_v42  ;;  %v1878_v25 = vmul.f32 %v1876_v19, %v1832_v40 }
 0x803   :  { %2407 = vrcp.f32 %v1837_v44 }
 0x804   :  { %2409 = vrcp.f32 %v1836_v46 }
 0x80d   :  { %v2408_v47 = vpop.eup %2407 }
 0x80e   :  { %v2410_v15 = vpop.eup %2409  ;;  %v1841_v48 = vmul.f32 0.17087276, %v2408_v47 }
 0x80f   :  { %v1840_v1 = vmul.f32 0.17087276, %v2410_v15 }
 0x810   :  { %v1843_v0 = vadd.f32 -0.82215226, %v1841_v48  ;;  %v1828_v48 = vmul.f32 0.5, %v2810_v37 }
 0x811   :  { %v1842_v49 = vadd.f32 -0.82215226, %v1840_v1 }
 0x812   :  { %v1845_v50 = vmul.f32 %v2408_v47, %v1843_v0 }
 0x813   :  { %v1844_v51 = vmul.f32 %v2410_v15, %v1842_v49 }
 0x814   :  { %v1847_v52 = vadd.f32 1.4885159, %v1845_v50 }
 0x815   :  { %v1846_v53 = vadd.f32 1.4885159, %v1844_v51 }
 0x816   :  { %v1849_v54 = vmul.f32 %v2408_v47, %v1847_v52 }
 0x817   :  { %v1848_v57 = vmul.f32 %v2410_v15, %v1846_v53 }
 0x818   :  { %v1851_v58 = vadd.f32 -1.135204, %v1849_v54 }
 0x819   :  { %v1850_v59 = vadd.f32 -1.135204, %v1848_v57 }
 0x81a   :  { %v1853_v60 = vmul.f32 %v2408_v47, %v1851_v58 }
 0x81b   :  { %v1852_v61 = vmul.f32 %v2410_v15, %v1850_v59 }
 0x81c   :  { %v1855_v62 = vadd.f32 0.27886808, %v1853_v60 }
 0x81d   :  { %v1854_v63 = vadd.f32 0.27886808, %v1852_v61 }
 0x81e   :  { %v1857_v2 = vmul.f32 %v2408_v47, %v1855_v62 }
 0x81f   :  { %v1856_v3 = vmul.f32 %v2410_v15, %v1854_v63 }
 0x820   :  { %v1859_v56 = vadd.f32 -0.18628806, %v1857_v2 }
 0x821   :  { %v1858_v4 = vadd.f32 -0.18628806, %v1856_v3 }
 0x822   :  { %v1861_v5 = vmul.f32 %v2408_v47, %v1859_v56 }
 0x823   :  { %v1860_v6 = vmul.f32 %v2410_v15, %v1858_v4 }
 0x824   :  { %v1863_v7 = vadd.f32 0.09678418, %v1861_v5 }
 0x825   :  { %v1862_v8 = vadd.f32 0.09678418, %v1860_v6 }
 0x826   :  { %v1865_v9 = vmul.f32 %v2408_v47, %v1863_v7 }
 0x827   :  { %v1864_v10 = vmul.f32 %v2410_v15, %v1862_v8 }
 0x828   :  { %v1867_v11 = vadd.f32 0.37409195, %v1865_v9 }
 0x829   :  { %v1866_v12 = vadd.f32 0.37409195, %v1864_v10 }
 0x82a   :  { %v1869_v13 = vmul.f32 %v2408_v47, %v1867_v11 }
 0x82b   :  { %v1868_v14 = vmul.f32 %v2410_v15, %v1866_v12 }
 0x82c   :  { %v1871_v16 = vadd.f32 1.0000237, %v1869_v13 }
 0x82d   :  { %v1870_v18 = vadd.f32 1.0000237, %v1868_v14 }
 0x82e   :  { %v1873_v20 = vmul.f32 %v2408_v47, %v1871_v16 }
 0x82f   :  { %v1872_v21 = vmul.f32 %v2410_v15, %v1870_v18 }
 0x830   :  { %v1875_v22 = vadd.f32 -1.2655122, %v1873_v20 }
 0x831   :  { %v1874_v24 = vadd.f32 -1.2655122, %v1872_v21 }
 0x832   :  { %v1881_v26 = vadd.f32 %v1879_v23, %v1875_v22 }
 0x833   :  { %v1880_v27 = vadd.f32 %v1878_v25, %v1874_v24 }
 0x834   :  { %v1884_v28 = vmul.f32 1.442695, %v1881_v26 }
 0x835   :  { %v1882_v29 = vmul.f32 1.442695, %v1880_v27 }
 0x836   :  { %2411 = vpow2.f32 %v1884_v28 }
 0x837   :  { %2413 = vpow2.f32 %v1882_v29 }
 0x840   :  { %v2412_v30 = vpop.eup %2411 }
 0x841   :  { %v2414_v31 = vpop.eup %2413  ;;  %v1887_v32 = vmul.f32 %v2412_v30, %v2408_v47 }
 0x842   :  { %v1886_v33 = vmul.f32 %v2414_v31, %v2410_v15 }
 0x843   :  { %v1889_v34 = vsub.f32 1.0, %v1887_v32 }
 0x844   :  { %v1888_v36 = vsub.f32 1.0, %v1886_v33 }
 0x845   :  { %v1893_v41 = vsub.f32 0.0, %v1889_v34 }
 0x846   :  { %v1892_v42 = vsub.f32 0.0, %v1888_v36 }
 0x847   :  { %v1895_v44 = vsel %vm1891_vm5, %v1889_v34, %v1893_v41 }
 0x848   :  { %v1897_v40 = vadd.f32 1.0, %v1895_v44  ;;  %v1894_v46 = vsel %vm1890_vm6, %v1888_v36, %v1892_v42 }
 0x849   :  { %v1896_v1 = vadd.f32 1.0, %v1894_v46 }
 0x84a   :  { %v1899_v0 = vmul.f32 %v1897_v40, %v1829_v55 }
 0x84b   :  { %v1898_v49 = vmul.f32 %v1896_v1, %v1828_v48 }
 0x84d   :  { %2269 = vmatprep.mubr.msk.f32.mxu0 %vm945_vm3, %v1898_v49 }
 0x84e   :  { %2270 = vmatmul.mubr.msk.f32.vlgmr.msra.gmra.mrb[22].mxu0 %vm945_vm3, %v1899_v0 }
 0x921   :  { %v2271_v47 = vpop.f32.mrb[22].mxu0 }
 0x922   :  { %v1982_v15 = vadd.f32 %v2271_v47, %v2041_v38  ;;  %v1976_v39 = vpop.f32.mrb[23].mxu0 }
 0x923   :  { %v1977_v35 = vadd.f32 %v2041_v38, %v1976_v39 }
 0x924   :  { %v1986_v50 = vadd.f32 %v1982_v15, %v2744_v45 }
 0x925   :  { %v1985_v37 = vadd.f32 %v1977_v35, %v2747_v43 }
 0x926   :  { %1988 = vst.msk [vmem:[#allocation2 + $0x8] sm:$0xff] %vm73_vm0, %v1986_v50 }
 0x927   :  { %1987 = vst.msk [vmem:[#allocation2] sm:$0xff] %vm73_vm0, %v1985_v37 }
 0x928   :  { %2426 = shalt.err (!%p2423_p4)
}
 0x929   :  { %s2427_s19 = scalar_lea.hbm %s2851_s6, 256 }
 0x92a   :  { %p2428_p5 = scmp.ne.s32.totalorder %s2851_s6, %s2427_s19  ;;  %p2431_p6 = scmp.lt.u32.totalorder %s2427_s19, %s2851_s6 }
 0x92c   :  { %p2433_p7 = pnand %p2431_p6, %p2428_p5 }
 0x92e   :  { %2436 = shalt.err (!%p2433_p7)
}
 0x92f   :  { %s2445_s23 = smov 128   ;;  %s2446_s1 = smov 8  }
 0x930   :  { %2000 = dma.vmem_to_hbm [thread:$0]  %s1995_s16, 256, %s2851_s6, [#allocation3], %s2445_s23, %s2445_s23, %s2446_s1  }
 0x931   :  { %2437 = dma.done.wait [#allocation3], 256  }
 0x932   :  { %2438 = vsyncadd [#allocation3], 4294967040 }
 0x933   :  { %2004 = vsyncpa [#allocation3], 1 }

</bundles_post_ra>
